<compile_context>
chip_gen: v6e
topology: v6e:2x2x1
jax: 0.10.0
libtpu: 0.0.40
codegen_flags: <defaults>
</compile_context>

<pallas_src>
import functools

import jax
import jax.numpy as jnp
from jax.experimental import pallas as pl
from jax.experimental.pallas import tpu as pltpu

NEG_INF = -1e32  # matches the PyTorch module's NEG_INF


def _round_up(x: int, m: int) -> int:
    return (x + m - 1) // m * m


# --------------------------------------------------------------------------- #
# Kernel
# --------------------------------------------------------------------------- #
def _soft_attention_concat_kernel(
    outputs_ref,      # (Bb, Sb, D)  input dtype
    last_hidden_ref,  # (Bb, 1, D)   input dtype
    seq_lens_ref,     # (Bb, 1, 1)   int32
    out_ref,          # (Bb, 2, D)   input dtype   [row 0]=last_outputs, [row 1]=attention
    m_ref,            # (Bb, 1, 1)   f32 scratch   running max
    l_ref,            # (Bb, 1, 1)   f32 scratch   running softmax denominator
    acc_ref,          # (Bb, 2, D)   f32 scratch   fused [last; attention] accumulator
    *,
    mask_tail_cols: bool,
    precision,
):
    si = pl.program_id(1)
    ns = pl.num_programs(1)
    Bb, Sb, _ = outputs_ref.shape

    @pl.when(si == 0)
    def _init():
        m_ref[...] = jnp.full_like(m_ref, NEG_INF)
        l_ref[...] = jnp.zeros_like(l_ref)
        acc_ref[...] = jnp.zeros_like(acc_ref)

    outputs = outputs_ref[...]           # (Bb, Sb, D)
    last_hidden = last_hidden_ref[...]   # (Bb, 1, D)
    lens = seq_lens_ref[...]             # (Bb, 1, 1) int32

    # --- attention scores on the MXU: Q @ K^T pattern, same as the canonical
    #     flash-attention kernel; the big (Sb, D) tile is consumed in stored
    #     layout (no XLU transpose of the large operand).
    scores = jnp.einsum(
        "bqd,bsd->bqs", last_hidden, outputs,
        preferred_element_type=jnp.float32, precision=precision,
    )                                                        # (Bb, 1, Sb) f32

    pos = si * Sb + jax.lax.broadcasted_iota(jnp.int32, (Bb, 1, Sb), 2)
    valid = pos < lens
    scores = jnp.where(valid, scores, NEG_INF)

    # --- online (chunked) masked softmax statistics, all in f32.
    m_prev = m_ref[...]
    m_new = jnp.maximum(m_prev, jnp.max(scores, axis=2, keepdims=True))   # (Bb,1,1)
    alpha = jnp.exp(m_prev - m_new)                                       # (Bb,1,1)
    p = jnp.exp(scores - m_new)                                           # (Bb,1,Sb)
    l_ref[...] = alpha * l_ref[...] + jnp.sum(p, axis=2, keepdims=True)
    m_ref[...] = m_new

    # --- one-hot selector of the last valid timestep (non-zero in exactly one
    #     sequence chunk).
    onehot = jnp.where(pos == lens - 1, 1.0, 0.0)                         # (Bb,1,Sb) f32

    if mask_tail_cols:
        # Ragged last S chunk: zero the out-of-range rows of the big tile so
        # stale VMEM (possibly Inf/NaN) cannot leak into the weighted sum via
        # 0 * NaN.  Only emitted when S % Sb != 0 (static flag).
        pos_col = si * Sb + jax.lax.broadcasted_iota(jnp.int32, (Bb, Sb, 1), 1)
        outputs = jnp.where(pos_col < lens, outputs, 0.0)

    # --- fused gather + weighted sum: a single MXU pass over `outputs`
    #     (w is (2, Sb) per batch row; contraction dim S is the sublane dim of
    #     the big operand -> natural MXU orientation, no transpose).
    w = jnp.concatenate([onehot, p], axis=1).astype(outputs.dtype)        # (Bb,2,Sb)
    contrib = jnp.einsum(
        "bks,bsd->bkd", w, outputs,
        preferred_element_type=jnp.float32, precision=precision,
    )                                                                     # (Bb,2,D) f32

    # row 0 (last_outputs) is never rescaled; row 1 (attention) follows the
    # online-softmax rescaling.
    scale = jnp.concatenate([jnp.ones_like(alpha), alpha], axis=1)        # (Bb,2,1)
    acc_ref[...] = scale * acc_ref[...] + contrib

    @pl.when(si == ns - 1)
    def _finalize():
        inv_l = pl.reciprocal(l_ref[...], approx=False)                   # (Bb,1,1)
        norm = jnp.concatenate([jnp.ones_like(inv_l), inv_l], axis=1)     # (Bb,2,1)
        out_ref[...] = (acc_ref[...] * norm).astype(out_ref.dtype)


# --------------------------------------------------------------------------- #
# Wrapper: per-generation tiling / VMEM / core selection
# --------------------------------------------------------------------------- #
def _tpu_target():
    """Best-effort TPU generation + TensorCores-per-chip detection."""
    try:
        dev = jax.devices()[0]
        if dev.platform != "tpu":
            return "unknown", 1
        kind = dev.device_kind.lower()
    except Exception:
        return "unknown", 1
    if "v5 lite" in kind or "v5lite" in kind or "v5e" in kind:
        return "v5e", 1
    if "v6" in kind:
        return "v6e", 1
    if "v7" in kind or "tpu7" in kind:
        return "v7x", 2
    return "unknown", 1


# Per-step `outputs` block budget.  ~0.35us fixed per grid step means the block
# has to grow with HBM bandwidth to stay near roofline; v7x also has only
# 64 MiB physical VMEM so 2 x 14 MiB double-buffered still leaves headroom.
_BLOCK_BUDGET_BYTES = {
    "v5e": 6 << 20,
    "v6e": 8 << 20,
    "v7x": 14 << 20,
    "unknown": 8 << 20,
}


def _choose_tiles(B, S, D, itemsize, budget_bytes, n_cores, block_b, block_s):
    if block_b is not None or block_s is not None:
        Bb = min(B, block_b) if block_b is not None else min(B, 8)
        Sb = min(S, block_s) if block_s is not None else S
        return max(1, Bb), max(1, Sb)

    Dp = _round_up(D, 128)
    full_s_row_bytes = _round_up(S, 8) * Dp * itemsize

    rows = budget_bytes // full_s_row_bytes
    if rows >= 1:
        # Full-sequence blocks; shrink only the batch tile (no padding, the
        # ragged last block is handled by masked edge DMA).
        Bb = min(B, int(rows))
        if Bb >= 8:
            Bb = (Bb // 8) * 8
            if B > 8:
                # Keep >= 2 grid steps per core so the DMA pipeline has work to
                # overlap and v7x's two TensorCores both get batch blocks.
                min_steps = 2 * max(1, n_cores)
                target = _round_up(max(1, -(-B // min_steps)), 8)
                Bb = max(8, min(Bb, target))
        return Bb, S

    # Even a single full-S row exceeds the budget: tile the sequence axis and
    # use the online-softmax accumulator path (VMEM safety valve).
    Bb = min(B, 8)
    sb_rows = budget_bytes // max(1, Bb * Dp * itemsize)
    Sb = max(8, (int(sb_rows) // 8) * 8)
    Sb = min(Sb, S)
    return Bb, Sb


def _vmem_limit_bytes(Bb, Sb, D, itemsize, gen):
    Dp = _round_up(D, 128)
    Sp = _round_up(Sb, 8)
    in_blk = Bb * Sp * Dp * itemsize           # (Bb, Sb, D)
    lh_blk = Bb * 8 * Dp * itemsize            # (Bb, 1, D)   -> padded to (8, Dp)
    len_blk = Bb * 8 * 128 * 4                 # (Bb, 1, 1)   int32
    out_blk = Bb * 8 * Dp * itemsize           # (Bb, 2, D)   -> padded to (8, Dp)
    scratch = Bb * 8 * Dp * 4 + 2 * Bb * 8 * 128 * 4
    total = 2 * (in_blk + lh_blk + len_blk + out_blk) + scratch   # double-buffered specs
    limit = int(total * 1.25) + (2 << 20)
    cap = (56 << 20) if gen == "v7x" else (100 << 20)             # stay under physical VMEM
    return max(32 << 20, min(cap, limit))


def soft_attention_concat(outputs, last_hidden, seq_lens, *,
                          block_b=None, block_s=None, matmul_precision=None):
    """outputs: (B,S,D), last_hidden: (B,D), seq_lens: (B,) int -> (B, 2*D)."""
    B, S, D = outputs.shape
    assert last_hidden.shape == (B, D)
    assert seq_lens.shape == (B,)
    dtype = outputs.dtype
    itemsize = jnp.dtype(dtype).itemsize

    gen, n_cores = _tpu_target()
    budget = _BLOCK_BUDGET_BYTES.get(gen, _BLOCK_BUDGET_BYTES["unknown"])
    Bb, Sb = _choose_tiles(B, S, D, itemsize, budget, n_cores, block_b, block_s)
    nb = pl.cdiv(B, Bb)
    ns = pl.cdiv(S, Sb)
    mask_tail = (S % Sb) != 0

    if matmul_precision is None:
        # f32 inputs: HIGHEST for bit-parity with the f32 reference (on v5e one
        # may pass jax.lax.Precision.HIGH / DEFAULT to cut MXU passes).
        # bf16 inputs: native single-pass MXU, no override.
        matmul_precision = (jax.lax.Precision.HIGHEST
                            if jnp.dtype(dtype) == jnp.float32 else None)

    # No batch/sequence padding of the big tensor: grid is cdiv-based, ragged
    # edges handled by masked DMA (batch garbage rows never written back;
    # ragged-S garbage columns zeroed inside the kernel via `mask_tail`).
    last_hidden_3d = last_hidden[:, None, :]                   # (B, 1, D) free reshape
    seq_lens_3d = seq_lens.astype(jnp.int32).reshape(B, 1, 1)  # (B, 1, 1)

    kernel = functools.partial(
        _soft_attention_concat_kernel,
        mask_tail_cols=mask_tail,
        precision=matmul_precision,
    )
    vmem_limit = _vmem_limit_bytes(Bb, Sb, D, itemsize, gen)

    def run(dim_semantics):
        return pl.pallas_call(
            kernel,
            out_shape=jax.ShapeDtypeStruct((B, 2, D), dtype),
            grid=(nb, ns),
            in_specs=[
                pl.BlockSpec((Bb, Sb, D), lambda b, s: (b, s, 0)),
                pl.BlockSpec((Bb, 1, D), lambda b, s: (b, 0, 0)),
                pl.BlockSpec((Bb, 1, 1), lambda b, s: (b, 0, 0)),
            ],
            out_specs=pl.BlockSpec((Bb, 2, D), lambda b, s: (b, 0, 0)),
            scratch_shapes=[
                pltpu.VMEM((Bb, 1, 1), jnp.float32),   # running max
                pltpu.VMEM((Bb, 1, 1), jnp.float32),   # running denominator
                pltpu.VMEM((Bb, 2, D), jnp.float32),   # fused [last; attention] accumulator
            ],
            compiler_params=pltpu.CompilerParams(
                dimension_semantics=dim_semantics,
                vmem_limit_bytes=vmem_limit,
            ),
        )(outputs, last_hidden_3d, seq_lens_3d)

    # v7x has 2 TensorCores per chip; plain "parallel" does not split the grid
    # across them, CORE_PARALLEL does.  Guarded + fallback so single-TC chips
    # (or unexpected lowering limits) never break the call.
    if n_cores > 1 and nb % n_cores == 0 and nb >= 2 * n_cores:
        try:
            out3 = run((pltpu.CORE_PARALLEL, pltpu.ARBITRARY))
        except Exception:
            out3 = run(("parallel", "arbitrary"))
    else:
        out3 = run(("parallel", "arbitrary"))

    # (B, 2, D) -> (B, 2*D) is a free row-major reshape == torch.cat(dim=1).
    return out3.reshape(B, 2 * D)


# --------------------------------------------------------------------------- #
# Pure-JAX reference + self-test
# --------------------------------------------------------------------------- #
def _reference(outputs, last_hidden, seq_lens):
    B, S, _ = outputs.shape
    hp = jax.lax.Precision.HIGHEST
    o32 = outputs.astype(jnp.float32)
    h32 = last_hidden.astype(jnp.float32)
    scores = jnp.einsum("bsd,bd->bs", o32, h32, precision=hp)
    mask = (jnp.arange(S)[None, :] < seq_lens[:, None]).astype(jnp.float32)
    scores = scores + (1.0 - mask) * NEG_INF
    probs = jax.nn.softmax(scores, axis=1)
    attention = jnp.einsum("bs,bsd->bd", probs, o32, precision=hp)
    last_outputs = o32[jnp.arange(B), seq_lens - 1]
    return jnp.concatenate([last_outputs, attention], axis=1)


if __name__ == "__main__":
    root = jax.random.PRNGKey(0)
    k_main, k_ragged, k_bf16 = jax.random.split(root, 3)

    # 1) main config (f32): auto tiling -> Bb=8, full-S blocks, grid (2, 1).
    B, S, D = 16, 16, 128
    k1, k2, k3 = jax.random.split(k_main, 3)
    outputs = jax.random.normal(k1, (B, S, D), dtype=jnp.float32)
    last_hidden = jax.random.normal(k2, (B, D), dtype=jnp.float32)
    seq_lens = jax.random.randint(k3, (B,), 1, S + 1).astype(jnp.int32).at[0].set(S)
    got = jax.block_until_ready(soft_attention_concat(outputs, last_hidden, seq_lens))
    want = _reference(outputs, last_hidden, seq_lens)
    assert got.shape == (B, 2 * D)
    err = float(jnp.max(jnp.abs(got - want)))
    assert jnp.allclose(got, want, atol=1e-4, rtol=1e-4), f"f32 max abs err = {err}"

    # 2) ragged batch + sequence-tiled online-softmax path (no padding copies):
    #    B=13 with Bb=8 (ragged batch block), S=20 with Sb=8 (ragged S chunk).
    B, S, D = 13, 20, 128
    k1, k2, k3 = jax.random.split(k_ragged, 3)
    outputs = jax.random.normal(k1, (B, S, D), dtype=jnp.float32)
    last_hidden = jax.random.normal(k2, (B, D), dtype=jnp.float32)
    seq_lens = jax.random.randint(k3, (B,), 1, S + 1).astype(jnp.int32).at[0].set(S)
    got = jax.block_until_ready(
        soft_attention_concat(outputs, last_hidden, seq_lens, block_b=8, block_s=8))
    want = _reference(outputs, last_hidden, seq_lens)
    err = float(jnp.max(jnp.abs(got - want)))
    assert jnp.allclose(got, want, atol=1e-4, rtol=1e-4), f"ragged max abs err = {err}"

    # 3) bf16 inputs (probs are cast to bf16 for the weighted sum -> looser tol).
    B, S, D = 5, 7, 256
    k1, k2, k3 = jax.random.split(k_bf16, 3)
    outputs = jax.random.normal(k1, (B, S, D), dtype=jnp.bfloat16)
    last_hidden = jax.random.normal(k2, (B, D), dtype=jnp.bfloat16)
    seq_lens = jax.random.randint(k3, (B,), 1, S + 1).astype(jnp.int32).at[0].set(S)
    got = jax.block_until_ready(soft_attention_concat(outputs, last_hidden, seq_lens))
    want = _reference(outputs, last_hidden, seq_lens)
    err = float(jnp.max(jnp.abs(got.astype(jnp.float32) - want)))
    assert jnp.allclose(got.astype(jnp.float32), want, atol=5e-2, rtol=5e-2), \
        f"bf16 max abs err = {err}"

    print("KERNEL_OK")
</pallas_src>

<mosaic_0001>
module attributes {stable_mosaic.version = 11 : i64} {
  func.func @_soft_attention_concat_kernel(%arg0: i32, %arg1: i32, %arg2: memref<8x16x128xf32, #tpu.memory_space<vmem>>, %arg3: memref<8x1x128xf32, #tpu.memory_space<vmem>>, %arg4: memref<8x1x1xi32, #tpu.memory_space<vmem>>, %arg5: memref<8x2x128xf32, #tpu.memory_space<vmem>>, %arg6: memref<8x1x1xf32, #tpu.memory_space<vmem>>, %arg7: memref<8x1x1xf32, #tpu.memory_space<vmem>>, %arg8: memref<8x2x128xf32, #tpu.memory_space<vmem>>) attributes {dimension_semantics = [#tpu.dimension_semantics<parallel>, #tpu.dimension_semantics<arbitrary>], iteration_bounds = array<i64: 2, 1>, scalar_prefetch = 0 : i64, scratch_operands = 3 : i64, tpu.core_type = #tpu.core_type<tc>, window_params = [{transform_indices = @transform_0, window_bounds = array<i64: 8, 16, 128>}, {transform_indices = @transform_1, window_bounds = array<i64: 8, 1, 128>}, {transform_indices = @transform_2, window_bounds = array<i64: 8, 1, 1>}, {transform_indices = @transform_3, window_bounds = array<i64: 8, 2, 128>}]} {
    %c0_i32 = arith.constant 0 : i32
    %0 = arith.cmpi eq, %arg1, %c0_i32 : i32
    %1 = arith.extui %0 : i1 to i32
    %c0_i32_0 = arith.constant 0 : i32
    %2 = arith.cmpi ne, %1, %c0_i32_0 : i32
    scf.if %2 {
      %cst_36 = arith.constant -1.000000e+32 : f32
      %50 = vector.broadcast %cst_36 : f32 to vector<8x1x1xf32>
      %c0_37 = arith.constant 0 : index
      %c0_38 = arith.constant 0 : index
      %c0_39 = arith.constant 0 : index
      %51 = vector.load %arg6[%c0_37, %c0_38, %c0_39] : memref<8x1x1xf32, #tpu.memory_space<vmem>>, vector<8x1x1xf32>
      tpu.vector_store %arg6[%c0_37, %c0_38, %c0_39], %50 {strides = array<i32>} : memref<8x1x1xf32, #tpu.memory_space<vmem>>, vector<8x1x1xf32>,
      %cst_40 = arith.constant 0.000000e+00 : f32
      %52 = vector.broadcast %cst_40 : f32 to vector<8x1x1xf32>
      %c0_41 = arith.constant 0 : index
      %c0_42 = arith.constant 0 : index
      %c0_43 = arith.constant 0 : index
      %53 = vector.load %arg7[%c0_41, %c0_42, %c0_43] : memref<8x1x1xf32, #tpu.memory_space<vmem>>, vector<8x1x1xf32>
      tpu.vector_store %arg7[%c0_41, %c0_42, %c0_43], %52 {strides = array<i32>} : memref<8x1x1xf32, #tpu.memory_space<vmem>>, vector<8x1x1xf32>,
      %cst_44 = arith.constant 0.000000e+00 : f32
      %54 = vector.broadcast %cst_44 : f32 to vector<8x2x128xf32>
      %c0_45 = arith.constant 0 : index
      %c0_46 = arith.constant 0 : index
      %c0_47 = arith.constant 0 : index
      %55 = vector.load %arg8[%c0_45, %c0_46, %c0_47] : memref<8x2x128xf32, #tpu.memory_space<vmem>>, vector<8x2x128xf32>
      tpu.vector_store %arg8[%c0_45, %c0_46, %c0_47], %54 {strides = array<i32>} : memref<8x2x128xf32, #tpu.memory_space<vmem>>, vector<8x2x128xf32>,
    } else {
    }
    %c0 = arith.constant 0 : index
    %c0_1 = arith.constant 0 : index
    %c0_2 = arith.constant 0 : index
    %3 = vector.load %arg2[%c0, %c0_1, %c0_2] : memref<8x16x128xf32, #tpu.memory_space<vmem>>, vector<8x16x128xf32>
    %c0_3 = arith.constant 0 : index
    %c0_4 = arith.constant 0 : index
    %c0_5 = arith.constant 0 : index
    %4 = vector.load %arg3[%c0_3, %c0_4, %c0_5] : memref<8x1x128xf32, #tpu.memory_space<vmem>>, vector<8x1x128xf32>
    %c0_6 = arith.constant 0 : index
    %c0_7 = arith.constant 0 : index
    %c0_8 = arith.constant 0 : index
    %5 = vector.load %arg4[%c0_6, %c0_7, %c0_8] : memref<8x1x1xi32, #tpu.memory_space<vmem>>, vector<8x1x1xi32>
    "tpu.trace_start"() <{level = 10 : i32, message = "bqd,bsd->bqs"}> : () -> ()
    %cst = arith.constant dense<0.000000e+00> : vector<8x1x16xf32>
    %6 = tpu.matmul %4, %3, %cst {dimension_numbers = #tpu.dot_dimension_numbers<[2], [2], [1], [1], [0, 0, 0, 1, 1, 1], [0], [0]>, precision = #tpu.contract_precision<fp32>} : vector<8x1x128xf32>, vector<8x16x128xf32>, vector<8x1x16xf32> -> vector<8x1x16xf32>
    "tpu.trace_stop"() : () -> ()
    %c16_i32 = arith.constant 16 : i32
    %7 = arith.muli %arg1, %c16_i32 : i32
    %8 = tpu.iota {dimensions = array<i32: 2>} : vector<8x1x16xi32>
    %9 = vector.broadcast %7 : i32 to vector<8x1x16xi32>
    %10 = arith.addi %9, %8 : vector<8x1x16xi32>
    %11 = vector.broadcast %5 : vector<8x1x1xi32> to vector<8x1x16xi32>
    %12 = arith.cmpi slt, %10, %11 : vector<8x1x16xi32>
    %cst_9 = arith.constant -1.000000e+32 : f32
    %13 = vector.broadcast %cst_9 : f32 to vector<8x1x16xf32>
    %14 = arith.select %12, %6, %13 : vector<8x1x16xi1>, vector<8x1x16xf32>
    %c0_10 = arith.constant 0 : index
    %c0_11 = arith.constant 0 : index
    %c0_12 = arith.constant 0 : index
    %15 = vector.load %arg6[%c0_10, %c0_11, %c0_12] : memref<8x1x1xf32, #tpu.memory_space<vmem>>, vector<8x1x1xf32>
    %cst_13 = arith.constant dense<0xFF800000> : vector<8x1xf32>
    %16 = vector.multi_reduction <maximumf>, %14, %cst_13 [2] : vector<8x1x16xf32> to vector<8x1xf32>
    %17 = vector.shape_cast %16 : vector<8x1xf32> to vector<8x1x1xf32>
    %18 = arith.maximumf %15, %17 : vector<8x1x1xf32>
    %19 = arith.subf %15, %18 : vector<8x1x1xf32>
    %20 = math.exp %19 : vector<8x1x1xf32>
    %21 = vector.broadcast %18 : vector<8x1x1xf32> to vector<8x1x16xf32>
    %22 = arith.subf %14, %21 : vector<8x1x16xf32>
    %23 = math.exp %22 : vector<8x1x16xf32>
    %c0_14 = arith.constant 0 : index
    %c0_15 = arith.constant 0 : index
    %c0_16 = arith.constant 0 : index
    %24 = vector.load %arg7[%c0_14, %c0_15, %c0_16] : memref<8x1x1xf32, #tpu.memory_space<vmem>>, vector<8x1x1xf32>
    %25 = arith.mulf %20, %24 : vector<8x1x1xf32>
    %cst_17 = arith.constant dense<0.000000e+00> : vector<8x1xf32>
    %26 = vector.multi_reduction <add>, %23, %cst_17 [2] : vector<8x1x16xf32> to vector<8x1xf32>
    %27 = vector.shape_cast %26 : vector<8x1xf32> to vector<8x1x1xf32>
    %28 = arith.addf %25, %27 : vector<8x1x1xf32>
    %c0_18 = arith.constant 0 : index
    %c0_19 = arith.constant 0 : index
    %c0_20 = arith.constant 0 : index
    %29 = vector.load %arg7[%c0_18, %c0_19, %c0_20] : memref<8x1x1xf32, #tpu.memory_space<vmem>>, vector<8x1x1xf32>
    tpu.vector_store %arg7[%c0_18, %c0_19, %c0_20], %28 {strides = array<i32>} : memref<8x1x1xf32, #tpu.memory_space<vmem>>, vector<8x1x1xf32>,
    %c0_21 = arith.constant 0 : index
    %c0_22 = arith.constant 0 : index
    %c0_23 = arith.constant 0 : index
    %30 = vector.load %arg6[%c0_21, %c0_22, %c0_23] : memref<8x1x1xf32, #tpu.memory_space<vmem>>, vector<8x1x1xf32>
    tpu.vector_store %arg6[%c0_21, %c0_22, %c0_23], %18 {strides = array<i32>} : memref<8x1x1xf32, #tpu.memory_space<vmem>>, vector<8x1x1xf32>,
    %c1_i32 = arith.constant 1 : i32
    %31 = vector.broadcast %c1_i32 : i32 to vector<8x1x1xi32>
    %32 = arith.subi %5, %31 : vector<8x1x1xi32>
    %33 = vector.broadcast %32 : vector<8x1x1xi32> to vector<8x1x16xi32>
    %34 = arith.cmpi eq, %10, %33 : vector<8x1x16xi32>
    %cst_24 = arith.constant 1.000000e+00 : f32
    %cst_25 = arith.constant 0.000000e+00 : f32
    %35 = vector.broadcast %cst_24 : f32 to vector<8x1x16xf32>
    %36 = vector.broadcast %cst_25 : f32 to vector<8x1x16xf32>
    %37 = arith.select %34, %35, %36 : vector<8x1x16xi1>, vector<8x1x16xf32>
    %38 = tpu.concatenate %37, %23 in 1 : vector<8x1x16xf32>, vector<8x1x16xf32> -> vector<8x2x16xf32>
    "tpu.trace_start"() <{level = 10 : i32, message = "bks,bsd->bkd"}> : () -> ()
    %cst_26 = arith.constant dense<0.000000e+00> : vector<8x2x128xf32>
    %39 = tpu.matmul %38, %3, %cst_26 {dimension_numbers = #tpu.dot_dimension_numbers<[2], [1], [1], [2], [0, 0, 0, 1, 1, 2], [0], [0]>, precision = #tpu.contract_precision<fp32>} : vector<8x2x16xf32>, vector<8x16x128xf32>, vector<8x2x128xf32> -> vector<8x2x128xf32>
    %cst_27 = arith.constant 1.000000e+00 : f32
    "tpu.trace_stop"() : () -> ()
    %40 = vector.broadcast %cst_27 : f32 to vector<8x1x1xf32>
    %41 = tpu.concatenate %40, %20 in 1 : vector<8x1x1xf32>, vector<8x1x1xf32> -> vector<8x2x1xf32>
    %c0_28 = arith.constant 0 : index
    %c0_29 = arith.constant 0 : index
    %c0_30 = arith.constant 0 : index
    %42 = vector.load %arg8[%c0_28, %c0_29, %c0_30] : memref<8x2x128xf32, #tpu.memory_space<vmem>>, vector<8x2x128xf32>
    %43 = vector.broadcast %41 : vector<8x2x1xf32> to vector<8x2x128xf32>
    %44 = arith.mulf %43, %42 : vector<8x2x128xf32>
    %45 = arith.addf %44, %39 : vector<8x2x128xf32>
    %c0_31 = arith.constant 0 : index
    %c0_32 = arith.constant 0 : index
    %c0_33 = arith.constant 0 : index
    %46 = vector.load %arg8[%c0_31, %c0_32, %c0_33] : memref<8x2x128xf32, #tpu.memory_space<vmem>>, vector<8x2x128xf32>
    tpu.vector_store %arg8[%c0_31, %c0_32, %c0_33], %45 {strides = array<i32>} : memref<8x2x128xf32, #tpu.memory_space<vmem>>, vector<8x2x128xf32>,
    %c0_i32_34 = arith.constant 0 : i32
    %47 = arith.cmpi eq, %arg1, %c0_i32_34 : i32
    %48 = arith.extui %47 : i1 to i32
    %c0_i32_35 = arith.constant 0 : i32
    %49 = arith.cmpi ne, %48, %c0_i32_35 : i32
    scf.if %49 {
      %c0_36 = arith.constant 0 : index
      %c0_37 = arith.constant 0 : index
      %c0_38 = arith.constant 0 : index
      %50 = vector.load %arg7[%c0_36, %c0_37, %c0_38] : memref<8x1x1xf32, #tpu.memory_space<vmem>>, vector<8x1x1xf32>
      %51 = tpu.reciprocal %50 : vector<8x1x1xf32> -> vector<8x1x1xf32>
      %cst_39 = arith.constant 1.000000e+00 : f32
      %52 = vector.broadcast %cst_39 : f32 to vector<8x1x1xf32>
      %53 = tpu.concatenate %52, %51 in 1 : vector<8x1x1xf32>, vector<8x1x1xf32> -> vector<8x2x1xf32>
      %c0_40 = arith.constant 0 : index
      %c0_41 = arith.constant 0 : index
      %c0_42 = arith.constant 0 : index
      %54 = vector.load %arg8[%c0_40, %c0_41, %c0_42] : memref<8x2x128xf32, #tpu.memory_space<vmem>>, vector<8x2x128xf32>
      %55 = vector.broadcast %53 : vector<8x2x1xf32> to vector<8x2x128xf32>
      %56 = arith.mulf %54, %55 : vector<8x2x128xf32>
      %c0_43 = arith.constant 0 : index
      %c0_44 = arith.constant 0 : index
      %c0_45 = arith.constant 0 : index
      %57 = vector.load %arg5[%c0_43, %c0_44, %c0_45] : memref<8x2x128xf32, #tpu.memory_space<vmem>>, vector<8x2x128xf32>
      tpu.vector_store %arg5[%c0_43, %c0_44, %c0_45], %56 {strides = array<i32>} : memref<8x2x128xf32, #tpu.memory_space<vmem>>, vector<8x2x128xf32>,
    } else {
    }
    return
  }
  func.func @transform_0(%arg0: i32, %arg1: i32) -> (i32, i32, i32) {
    %c0_i32 = arith.constant 0 : i32
    %c0_i32_0 = arith.constant 0 : i32
    return %arg0, %arg1, %c0_i32 : i32, i32, i32
  }
  func.func @transform_1(%arg0: i32, %arg1: i32) -> (i32, i32, i32) {
    %c0_i32 = arith.constant 0 : i32
    %c0_i32_0 = arith.constant 0 : i32
    %c0_i32_1 = arith.constant 0 : i32
    return %arg0, %c0_i32, %c0_i32_0 : i32, i32, i32
  }
  func.func @transform_2(%arg0: i32, %arg1: i32) -> (i32, i32, i32) {
    %c0_i32 = arith.constant 0 : i32
    %c0_i32_0 = arith.constant 0 : i32
    %c0_i32_1 = arith.constant 0 : i32
    return %arg0, %c0_i32, %c0_i32_0 : i32, i32, i32
  }
  func.func @transform_3(%arg0: i32, %arg1: i32) -> (i32, i32, i32) {
    %c0_i32 = arith.constant 0 : i32
    %c0_i32_0 = arith.constant 0 : i32
    %c0_i32_1 = arith.constant 0 : i32
    return %arg0, %c0_i32, %c0_i32_0 : i32, i32, i32
  }
}

</mosaic_0001>

<bundles_post_ra>
// kernel: tpu_custom_call.1
= control target key start
LH: loop header
LB: loop body
LE: loop exit
PB: predicated region body
PF: predicated region fallthrough
CT: control target
= control target key end

     0   :  { %8 = vsyncpa [#allocation6], 0  ;;  %s11120_s0 = inlined_call_operand.hbm [shape: f32[16,16,128], index: 0, kind: input, shape index: {}]   ;;  %s11121_s1 = inlined_call_operand.vmem [shape: f32[16,1,128], index: 1, kind: input, shape index: {}]   ;;  %s11122_s2 = inlined_call_operand.vmem [shape: s32[16,1,1], index: 2, kind: input, shape index: {}]   ;;  %s11123_s3 = inlined_call_operand.hbm [shape: f32[16,2,128], index: 3, kind: output, shape index: {}]  }
   0x1   :  { %10 = vsyncpa [#allocation6 + $0x1], 0 }
   0x2   :  { %11 = vsyncpa [#allocation7], 0 }
   0x3   :  { %13 = vsyncpa [#allocation7 + $0x1], 0  ;;  %s9731_s12 = smov 0   ;;  %s9733_s13 = smov 0  }
   0x4   :  { %s9735_s14 = smov 0   ;;  %s9737_s15 = smov 0  }
   0x5   :  { %s9739_s16 = smov 0   ;;  %s9741_s17 = smov 0  }
   0x6 LB: > { %s8476_s18 = sadd.s32 4294967295, %s9699_s17   ;;  %s8477_s19 = sadd.s32 4294967294, %s9699_s17   ;;  %s9699_s17 = sphi %s9741_s17, %s19_s17   ;;  %s9695_s16 = sphi %s9739_s16, %s11255_s16   ;;  %s9691_s15 = sphi %s9737_s15, %s11254_s15   ;;  %s9687_s14 = sphi %s9735_s14, %s11253_s14   ;;  %s9683_s13 = sphi %s9733_s13, %s11252_s13   ;;  %s9679_s12 = sphi %s9731_s12, %s11251_s12  }
   0x7   : > { %s31_s20 = sadd.s32 1, %s9695_s16  ;;  %s40_s21 = sadd.s32 1, %s9687_s14 }
   0x8   : > { %p33_p0 = scmp.ge.s32.totalorder %s31_s20, 2  ;;  %p47_p1 = scmp.ne.s32.totalorder %s9687_s14, %s9683_s13 }
   0x9   : > { %p48_p2 = scmp.eq.s32.totalorder %s9699_s17, 0  ;;  %p53_p3 = scmp.ne.s32.totalorder %s9683_s13, %s9679_s12 }
   0xa   : > { %s11257_s20 = smov (%p33_p0, %s31_s20), 0  ;;  %p54_p5 = scmp.eq.s32.totalorder %s8476_s18, 0 }
   0xb   : > { %p9772_p4 = por %p48_p2, %p47_p1  ;;  %s35_s23 = ssub.s32 %s9695_s16, %s11257_s20 }
   0xc   : > { %p129_p6 = scmp.eq.s32.totalorder %s8476_s18, 1  ;;  %p38_p7 = scmp.eq.s32.totalorder %s35_s23, 0 }
   0xd   : > { %p9778_p8 = por %p54_p5, %p53_p3  ;;  %p135_p10 = scmp.eq.s32.totalorder %s8477_s19, 1 }
   0xe   : > { %p9782_p9 = por %p129_p6, %p47_p1  ;;  %p9477_p13 = scmp.lt.s32.totalorder %s9699_s17, 2 }
   0xf   : > { %s9787_s26 = scalar_select %p38_p7, %s9687_s14, %s40_s21  }
  0x10   : > { %p9789_p11 = por %p135_p10, %p53_p3  ;;  %s155_s28 = sand.u32 1, %s9687_s14  }
  0x11   : > { %s8480_s29 = sshll.u32 %s155_s28, 7  ;;  %s8503_s30 = sshll.u32 %s9695_s16, 11 }
  0x12   : > { %s168_s6 = scalar_lea.hbm %s11120_s0, %s8503_s30  ;;  %s159_s7 = scalar_lea.vmem [#allocation5], %s8480_s29 }
  0x13   : > { %s169_s8 = sshll.u32 %s159_s7, 4  ;;  %p9802_p0 = pnand %p9477_p13, %p9772_p4  ;;  %s170_s8 = int_to_ptr.vmem [resolvable:$true] %s169_s8 }
  0x14   : > { %p8484_p1 = scmp.ge.s32.totalorder %s9699_s17, 1  ;;  %s156_s10 = scalar_lea.sflag [#allocation6], %s155_s28 }
  0x15   : > { %p9593_p2 = pneg %p9802_p0  ;;  %s9604_s11 = scalar_lea.vmem %s170_s8, 2048 }
  0x16   : > { %p9605_p3 = scmp.ne.s32.totalorder %s170_s8, %s9604_s11  ;;  %s9701_s18 = smov [#allocation5]  }
  0x17   : > { %s9609_s19 = sshll.u32 %s9701_s18, 4  ;;  %s9610_s19 = int_to_ptr.vmem [resolvable:$false] %s9609_s19 }
  0x18   : > { %p9607_p5 = pnand %p9605_p3, %p9593_p2  ;;  %s9611_s21 = scalar_lea.vmem %s9610_s19, 4096 }
  0x19   : > { %p9612_p7 = scmp.lt.s32.totalorder %s170_s8, %s9610_s19  ;;  %p9613_p10 = scmp.lt.s32.totalorder %s9611_s21, %s9604_s11 }
  0x1a   : > { %p9608_p6 = pneg %p9607_p5 }
  0x1b   : > { %p9614_p12 = por %p9613_p10, %p9612_p7 }
  0x1d   : > { %p9615_p4 = pnand %p9614_p12, %p9608_p6 }
  0x1f   : > { %9618 = shalt.err (!%p9615_p4)
}
  0x20   : > { %s9702_s22 = smov 128   ;;  %s9703_s23 = smov 8  }
  0x21   : > { %9472 = dma.hbm_to_vmem [thread:$0]  (!%p9802_p0), %s168_s6, 2048, %s170_s8, %s156_s10, %s9702_s22, %s9702_s22, %s9703_s23  }
  0x22   : > { %p193_p13 = scmp.lt.s32.totalorder %s9699_s17, 3 }
  0x24   : > { %p194_p2 = pnand %p8484_p1, %p193_p13 }
  0x26   : > { %197 = sbr.rel (%p194_p2) target bundleno = 1047 (0x417), region = 32 }
  0x2b   : > { %s9815_s28 = sand.u32 1, %s9683_s13  }
  0x2c   : > { %s8485_s29 = sshll.u32 %s9815_s28, 7  ;;  %s200_s30 = scalar_lea.sflag [#allocation6], %s9815_s28 }
  0x2d   : > { %s9819_s4 = scalar_lea.vmem [#allocation5], %s8485_s29 }
  0x2e   : > { %9670 = dma.done.wait (%p9778_p8), %s200_s30, 2048  }
  0x2f   : > { %9672 = vsyncadd (%p9778_p8), %s200_s30, 4294965248  ;;  %s8487_s5 = sshll.u32 %s9691_s15, 3  ;;  %v11145_v0 = vmov 0.0   ;;  %vm9705_vm0 = vmmov 0   ;;  %v9706_v1 = vmov 0   ;;  %v277_v2 = vld [vmem:[%s9819_s4 + $0x8] sm:$0xff] }
  0x30   : > { %8793 = vmatprep.subr.mxu0 %v11145_v0  ;;  %268 = vst [vmem:[#allocation4] sm:$0x3] %v11145_v0  ;;  %269 = vst [vmem:[#allocation4 + $0x2] sm:$0x3] %v11145_v0  ;;  %8800 = vmatprep.subr.mxu1 %v11145_v0  ;;  %p237_p8 = scmp.lt.s32.totalorder %s8487_s5, 15  ;;  %v276_v3 = vld [vmem:[%s9819_s4] sm:$0xff] }
  0x31   : > { %270 = vst [vmem:[#allocation4 + $0x4] sm:$0x3] %v11145_v0  ;;  %271 = vst [vmem:[#allocation4 + $0x6] sm:$0x3] %v11145_v0  ;;  %8797 = vmatprep.mubr.msk.f32.mxu0 %vm9705_vm0, %v11145_v0  ;;  %8804 = vmatprep.mubr.msk.f32.mxu1 %vm9705_vm0, %v11145_v0  ;;  %v9848_v5 = vand.u32 4294901760, %v277_v2  ;;  %v9850_v6 = vand.u32 4294901760, %v276_v3 }
  0x32   : > { %272 = vst [vmem:[#allocation4 + $0x8] sm:$0x3] %v11145_v0  ;;  %273 = vst [vmem:[#allocation4 + $0xa] sm:$0x3] %v11145_v0  ;;  %s11259_s5 = smov (!%p237_p8, %s8487_s5), 15  ;;  %9535 = vset.pattern.permute.xlu0 %v9706_v1  ;;  %9536 = vset.pattern.permute.xlu1 %v9706_v1  ;;  %v279_v23 = vld [vmem:[%s9819_s4 + $0x18] sm:$0xff] }
  0x33   : > { %274 = vst [vmem:[#allocation4 + $0xc] sm:$0x3] %v11145_v0  ;;  %275 = vst [vmem:[#allocation4 + $0xe] sm:$0x3] %v11145_v0  ;;  %s9843_s7 = scalar_lea.vmem %s11121_s1, %s11259_s5  ;;  %s9857_s10 = scalar_lea.vmem %s11122_s2, %s11259_s5  ;;  %8794 = vmatpush3.xpose.msra.mxu0 %v9848_v5  ;;  %v9861_v8 = vsub.f32 %v277_v2, %v9848_v5  ;;  %v9865_v10 = vsub.f32 %v276_v3, %v9850_v6  ;;  %v9896_v25 = vand.u32 4294901760, %v279_v23  ;;  %v278_v27 = vld [vmem:[%s9819_s4 + $0x10] sm:$0xff] }
  0x34   : > { %v292_v4 = vld [vmem:[%s9843_s7] sm:$0x1]  ;;  %8795 = vmatprep.subr.mxu0 %v11145_v0  ;;  %v301_v15 = vld [vmem:[%s9857_s10 + $0x1] sm:$0x1]  ;;  %v304_v22 = vld [vmem:[%s9857_s10 + $0x4] sm:$0x1] }
  0x35   : > { %v9852_v7 = vand.u32 4294901760, %v292_v4  ;;  %v300_v11 = vld [vmem:[%s9857_s10] sm:$0x1]  ;;  %v9870_v12 = vand.u32 4294901760, %v9861_v8  ;;  %v9873_v14 = vand.u32 4294901760, %v9865_v10  ;;  %v9906_v28 = vand.u32 4294901760, %v278_v27 }
  0x36   : > { %3986 = vperm.xlu0 %9535, %v300_v11   ;;  %v293_v24 = vld [vmem:[%s9843_s7 + $0x1] sm:$0x1]  ;;  %v9909_v29 = vsub.f32 %v279_v23, %v9896_v25  ;;  %v302_v31 = vld [vmem:[%s9857_s10 + $0x2] sm:$0x1]  ;;  %v281_v42 = vld [vmem:[%s9819_s4 + $0x28] sm:$0xff]  ;;  %vm4065_vm2 = vcmask 122880  }
  0x37   : > { %v376_v9 = vsub.f32 %v292_v4, %v9852_v7  ;;  %8796 = vmatpush3.xpose.msra.mxu0 %v9850_v6  ;;  %v417_v16 = vsub.f32 %v9861_v8, %v9870_v12  ;;  %v424_v18 = vsub.f32 %v9865_v10, %v9873_v14  ;;  %v9898_v26 = vand.u32 4294901760, %v293_v24  ;;  %4000 = vperm.xlu1 %9536, %v302_v31   ;;  %v294_v43 = vld [vmem:[%s9843_s7 + $0x2] sm:$0x1]  ;;  %v303_v50 = vld [vmem:[%s9857_s10 + $0x3] sm:$0x1]  ;;  %v283_v61 = vld [vmem:[%s9819_s4 + $0x38] sm:$0xff] }
  0x38   : > { %8807 = vmatprep.subr.mxu0 %v11145_v0  ;;  %v9924_v32 = vand.u32 4294901760, %v9909_v29  ;;  %v9928_v34 = vsub.f32 %v278_v27, %v9906_v28  ;;  %v9970_v44 = vand.u32 4294901760, %v281_v42  ;;  %v9972_v45 = vand.u32 4294901760, %v294_v43  ;;  %v280_v46 = vld [vmem:[%s9819_s4 + $0x20] sm:$0xff]  ;;  %v282_v2 = vld [vmem:[%s9819_s4 + $0x30] sm:$0xff]  ;;  %s8486_s11 = sshll.u32 %s9815_s28, 4 }
  0x39   : > { %v377_v13 = vand.u32 4294901760, %v376_v9  ;;  %v9882_v19 = vand.u32 4294901760, %v417_v16  ;;  %v9885_v21 = vand.u32 4294901760, %v424_v18  ;;  %v9912_v30 = vsub.f32 %v293_v24, %v9898_v26  ;;  %v295_v62 = vld [vmem:[%s9843_s7 + $0x3] sm:$0x1]  ;;  %s11053_s18 = scalar_lea.vmem [#allocation8], %s8486_s11 }
  0x3a   : > { %3993 = vperm.xlu0 %9535, %v301_v15   ;;  %v876_v35 = vsub.f32 %v9909_v29, %v9924_v32  ;;  %v9939_v37 = vand.u32 4294901760, %v9928_v34  ;;  %v9981_v47 = vand.u32 4294901760, %v280_v46  ;;  %v9984_v48 = vsub.f32 %v281_v42, %v9970_v44  ;;  %v305_v18 = vld [vmem:[%s9857_s10 + $0x5] sm:$0x1]  ;;  %v296_v27 = vld [vmem:[%s9843_s7 + $0x4] sm:$0x1] }
  0x3b   : > { %v378_v17 = vsub.f32 %v376_v9, %v377_v13  ;;  %8801 = vmatpush3.xpose.msra.mxu1 %v9882_v19  ;;  %v836_v33 = vand.u32 4294901760, %v9912_v30  ;;  %v9987_v49 = vsub.f32 %v294_v43, %v9972_v45  ;;  %4007 = vperm.xlu1 %9536, %v303_v50   ;;  %v10045_v63 = vand.u32 4294901760, %v283_v61  ;;  %s8374_s19 = sshll.u32 %s11053_s18, 4  ;;  %s8504_s21 = sshll.u32 %s9691_s15, 8  ;;  %s11066_s19 = int_to_ptr.vmem [resolvable:$true] %s8374_s19 }
  0x3c   : > { %8802 = vmatprep.subr.mxu1 %v11145_v0  ;;  %v9949_v38 = vand.u32 4294901760, %v876_v35  ;;  %v883_v40 = vsub.f32 %v9928_v34, %v9939_v37  ;;  %v9999_v51 = vand.u32 4294901760, %v9984_v48  ;;  %v10003_v53 = vsub.f32 %v280_v46, %v9981_v47  ;;  %v284_v35 = vld [vmem:[%s9819_s4 + $0x40] sm:$0xff]  ;;  %s11071_s29 = scalar_lea.hbm %s11123_s3, %s8504_s21  ;;  %s8361_s30 = scalar_lea.sflag [#allocation7], %s9815_s28 }
  0x3d   : > { %v379_v20 = vand.u32 4294901760, %v378_v17  ;;  %v837_v36 = vsub.f32 %v9912_v30, %v836_v33  ;;  %v1295_v52 = vand.u32 4294901760, %v9987_v49  ;;  %v10047_v1 = vand.u32 4294901760, %v295_v62  ;;  %s9708_s15 = smov [#allocation8]  }
  0x3e   : > { %4014 = vperm.xlu0 %9535, %v304_v22   ;;  %v9958_v41 = vand.u32 4294901760, %v883_v40  ;;  %v1335_v54 = vsub.f32 %v9984_v48, %v9999_v51  ;;  %v10014_v56 = vand.u32 4294901760, %v10003_v53  ;;  %v10056_v3 = vand.u32 4294901760, %v282_v2  ;;  %s9623_s5 = sshll.u32 %s9708_s15, 4  ;;  %s9624_s5 = int_to_ptr.vmem [resolvable:$false] %s9623_s5 }
  0x3f   : > { %8798 = vmatmul.mubr.f32.vlgmr.msra.gmra.mxu0 %v379_v20  ;;  %8803 = vmatpush3.xpose.msra.mxu1 %v9885_v21  ;;  %v838_v39 = vand.u32 4294901760, %v837_v36  ;;  %v1296_v55 = vsub.f32 %v9987_v49, %v1295_v52  ;;  %v10059_v4 = vsub.f32 %v283_v61, %v10045_v63  ;;  %v10135_v36 = vand.u32 4294901760, %v284_v35  ;;  %v297_v61 = vld [vmem:[%s9843_s7 + $0x5] sm:$0x1]  ;;  %s9625_s24 = scalar_lea.vmem %s9624_s5, 512  ;;  %p9626_p3 = scmp.lt.s32.totalorder %s11066_s19, %s9624_s5 }
  0x40   : > { %8808 = vmatpush3.xpose.msra.mxu0 %v9861_v8  ;;  %8811 = vmatprep.mubr.msk.f32.mxu0 %vm9705_vm0, %v11145_v0  ;;  %v10024_v57 = vand.u32 4294901760, %v1335_v54  ;;  %v1342_v59 = vsub.f32 %v10003_v53, %v10014_v56  ;;  %vm251_vm3 = vcmask 0   ;;  %vm4396_vm11 = vcmask 130048  }
  0x41   : > { %8809 = vmatprep.subr.mxu0 %v11145_v0  ;;  %8814 = vmatprep.subr.mxu1 %v11145_v0  ;;  %v1297_v58 = vand.u32 4294901760, %v1296_v55  ;;  %vm4387_vm13 = vcmask 1040384  }
  0x42   : > { %8805 = vmatmul.mubr.f32.vlgmr.msra.gmra.mxu1 %v9852_v7  ;;  %v10033_v60 = vand.u32 4294901760, %v1342_v59  ;;  %4021 = vperm.xlu1 %9536, %v305_v18   ;;  %v287_v59 = vld [vmem:[%s9819_s4 + $0x58] sm:$0xff] }
  0x43   : > { %8815 = vmatpush3.xpose.msra.mxu1 %v9848_v5  ;;  %8818 = vmatprep.mubr.msk.f32.mxu1 %vm9705_vm0, %v11145_v0 }
  0x44   : > { %8810 = vmatpush3.xpose.msra.mxu0 %v9865_v10  ;;  %8816 = vmatprep.subr.mxu1 %v11145_v0 }
  0x45   : > { %8821 = vmatprep.subr.mxu0 %v11145_v0 }
  0x47   : > { %8812 = vmatmul.mubr.f32.vlgmr.msra.gmra.mxu0 %v376_v9  ;;  %8817 = vmatpush3.xpose.msra.mxu1 %v9850_v6  ;;  %v10073_v9 = vand.u32 4294901760, %v10059_v4 }
  0x48   : > { %8822 = vmatpush3.xpose.msra.mxu0 %v9870_v12  ;;  %8825 = vmatprep.mubr.msk.f32.mxu0 %vm9705_vm0, %v11145_v0 }
  0x49   : > { %8823 = vmatprep.subr.mxu0 %v11145_v0  ;;  %8828 = vmatprep.subr.mxu1 %v11145_v0  ;;  %v1794_v15 = vsub.f32 %v10059_v4, %v10073_v9 }
  0x4a   : > { %8819 = vmatmul.mubr.f32.vlgmr.msra.gmra.mxu1 %v377_v13  ;;  %v10077_v13 = vsub.f32 %v282_v2, %v10056_v3  ;;  %v286_v2 = vld [vmem:[%s9819_s4 + $0x50] sm:$0xff] }
  0x4b   : > { %8829 = vmatpush3.xpose.msra.mxu1 %v9848_v5  ;;  %8832 = vmatprep.mubr.msk.f32.mxu1 %vm9705_vm0, %v11145_v0  ;;  %v10099_v20 = vand.u32 4294901760, %v1794_v15 }
  0x4c   : > { %8824 = vmatpush3.xpose.msra.mxu0 %v9873_v14  ;;  %8830 = vmatprep.subr.mxu1 %v11145_v0  ;;  %v10088_v17 = vand.u32 4294901760, %v10077_v13 }
  0x4d   : > { %8835 = vmatprep.subr.mxu0 %v11145_v0 }
  0x4e   : > { %v1801_v23 = vsub.f32 %v10077_v13, %v10088_v17 }
  0x4f   : > { %8826 = vmatmul.mubr.f32.vlgmr.msra.gmra.mxu0 %v9852_v7  ;;  %8831 = vmatpush3.xpose.msra.mxu1 %v9850_v6 }
  0x50   : > { %8836 = vmatpush3.xpose.msra.mxu0 %v9896_v25  ;;  %8839 = vmatprep.mubr.msk.f32.mxu0 %vm9705_vm0, %v11145_v0  ;;  %v10108_v24 = vand.u32 4294901760, %v1801_v23 }
  0x51   : > { %8837 = vmatprep.subr.mxu0 %v11145_v0  ;;  %8842 = vmatprep.subr.mxu1 %v11145_v0 }
  0x52   : > { %8833 = vmatmul.mubr.f32.vlgmr.msra.gmra.mxu1 %v9852_v7  ;;  %v10062_v7 = vsub.f32 %v295_v62, %v10047_v1  ;;  %v10198_v62 = vand.u32 4294901760, %v287_v59 }
  0x53   : > { %8843 = vmatpush3.xpose.msra.mxu1 %v9949_v38  ;;  %8846 = vmatprep.mubr.msk.f32.mxu1 %vm9705_vm0, %v11145_v0 }
  0x54   : > { %8838 = vmatpush3.xpose.msra.mxu0 %v9906_v28  ;;  %8844 = vmatprep.subr.mxu1 %v11145_v0  ;;  %v1754_v11 = vand.u32 4294901760, %v10062_v7  ;;  %11176 = vst [vmem:[#allocation15_spill] sm:$0xff] %v10198_v62 }
  0x55   : > { %8849 = vmatprep.subr.mxu0 %v11145_v0 }
  0x56   : > { %v1755_v16 = vsub.f32 %v10062_v7, %v1754_v11 }
  0x57   : > { %8840 = vmatmul.mubr.f32.vlgmr.msra.gmra.mxu0 %v838_v39  ;;  %8845 = vmatpush3.xpose.msra.mxu1 %v9958_v41 }
  0x58   : > { %8850 = vmatpush3.xpose.msra.mxu0 %v9909_v29  ;;  %8853 = vmatprep.mubr.msk.f32.mxu0 %vm9705_vm0, %v11145_v0  ;;  %v1756_v22 = vand.u32 4294901760, %v1755_v16 }
  0x59   : > { %8851 = vmatprep.subr.mxu0 %v11145_v0  ;;  %8856 = vmatprep.subr.mxu1 %v11145_v0 }
  0x5a   : > { %8847 = vmatmul.mubr.f32.vlgmr.msra.gmra.mxu1 %v9898_v26 }
  0x5b   : > { %8857 = vmatpush3.xpose.msra.mxu1 %v9896_v25  ;;  %8860 = vmatprep.mubr.msk.f32.mxu1 %vm9705_vm0, %v11145_v0 }
  0x5c   : > { %8852 = vmatpush3.xpose.msra.mxu0 %v9928_v34  ;;  %8858 = vmatprep.subr.mxu1 %v11145_v0 }
  0x5d   : > { %8863 = vmatprep.subr.mxu0 %v11145_v0 }
  0x5f   : > { %8854 = vmatmul.mubr.f32.vlgmr.msra.gmra.mxu0 %v9912_v30  ;;  %8859 = vmatpush3.xpose.msra.mxu1 %v9906_v28  ;;  %v10115_v30 = vld [vmem:[%s9857_s10 + $0x6] sm:$0x1] }
  0x60   : > { %8864 = vmatpush3.xpose.msra.mxu0 %v9924_v32  ;;  %8867 = vmatprep.mubr.msk.f32.mxu0 %vm9705_vm0, %v11145_v0 }
  0x61   : > { %8865 = vmatprep.subr.mxu0 %v11145_v0  ;;  %8870 = vmatprep.subr.mxu1 %v11145_v0 }
  0x62   : > { %8861 = vmatmul.mubr.f32.vlgmr.msra.gmra.mxu1 %v836_v33  ;;  %4028 = vperm.xlu1 %9536, %v10115_v30   ;;  %v10126_v33 = vand.u32 4294901760, %v296_v27 }
  0x63   : > { %8871 = vmatpush3.xpose.msra.mxu1 %v9896_v25  ;;  %8874 = vmatprep.mubr.msk.f32.mxu1 %vm9705_vm0, %v11145_v0 }
  0x64   : > { %8866 = vmatpush3.xpose.msra.mxu0 %v9939_v37  ;;  %8872 = vmatprep.subr.mxu1 %v11145_v0  ;;  %v10141_v40 = vsub.f32 %v296_v27, %v10126_v33 }
  0x65   : > { %8877 = vmatprep.subr.mxu0 %v11145_v0 }
  0x66   : > { %v2213_v43 = vand.u32 4294901760, %v10141_v40 }
  0x67   : > { %8868 = vmatmul.mubr.f32.vlgmr.msra.gmra.mxu0 %v9898_v26  ;;  %8873 = vmatpush3.xpose.msra.mxu1 %v9906_v28 }
  0x68   : > { %8878 = vmatpush3.xpose.msra.mxu0 %v9970_v44  ;;  %8881 = vmatprep.mubr.msk.f32.mxu0 %vm9705_vm0, %v11145_v0 }
  0x69   : > { %8879 = vmatprep.subr.mxu0 %v11145_v0  ;;  %8884 = vmatprep.subr.mxu1 %v11145_v0 }
  0x6a   : > { %8875 = vmatmul.mubr.f32.vlgmr.msra.gmra.mxu1 %v9898_v26  ;;  %v285_v26 = vld [vmem:[%s9819_s4 + $0x48] sm:$0xff] }
  0x6b   : > { %8885 = vmatpush3.xpose.msra.mxu1 %v10024_v57  ;;  %8888 = vmatprep.mubr.msk.f32.mxu1 %vm9705_vm0, %v11145_v0  ;;  %v10124_v31 = vand.u32 4294901760, %v285_v26 }
  0x6c   : > { %8880 = vmatpush3.xpose.msra.mxu0 %v9981_v47  ;;  %8886 = vmatprep.subr.mxu1 %v11145_v0 }
  0x6d   : > { %8891 = vmatprep.subr.mxu0 %v11145_v0  ;;  %v10138_v39 = vsub.f32 %v285_v26, %v10124_v31 }
  0x6f   : > { %8882 = vmatmul.mubr.f32.vlgmr.msra.gmra.mxu0 %v1297_v58  ;;  %8887 = vmatpush3.xpose.msra.mxu1 %v10033_v60  ;;  %11172 = vst [vmem:[#allocation11_spill] sm:$0xff] %v10138_v39  ;;  %v10152_v42 = vand.u32 4294901760, %v10138_v39 }
  0x70   : > { %8892 = vmatpush3.xpose.msra.mxu0 %v9984_v48  ;;  %8895 = vmatprep.mubr.msk.f32.mxu0 %vm9705_vm0, %v11145_v0 }
  0x71   : > { %8893 = vmatprep.subr.mxu0 %v11145_v0  ;;  %8898 = vmatprep.subr.mxu1 %v11145_v0  ;;  %11173 = vst [vmem:[#allocation12_spill] sm:$0xff] %v10152_v42  ;;  %v2253_v46 = vsub.f32 %v10138_v39, %v10152_v42 }
  0x72   : > { %8889 = vmatmul.mubr.f32.vlgmr.msra.gmra.mxu1 %v9972_v45 }
  0x73   : > { %8899 = vmatpush3.xpose.msra.mxu1 %v9970_v44  ;;  %8902 = vmatprep.mubr.msk.f32.mxu1 %vm9705_vm0, %v11145_v0 }
  0x74   : > { %8894 = vmatpush3.xpose.msra.mxu0 %v10003_v53  ;;  %8900 = vmatprep.subr.mxu1 %v11145_v0 }
  0x75   : > { %8905 = vmatprep.subr.mxu0 %v11145_v0 }
  0x77   : > { %8896 = vmatmul.mubr.f32.vlgmr.msra.gmra.mxu0 %v9987_v49  ;;  %8901 = vmatpush3.xpose.msra.mxu1 %v9981_v47  ;;  %v2214_v49 = vsub.f32 %v10141_v40, %v2213_v43 }
  0x78   : > { %8906 = vmatpush3.xpose.msra.mxu0 %v9999_v51  ;;  %8909 = vmatprep.mubr.msk.f32.mxu0 %vm9705_vm0, %v11145_v0 }
  0x79   : > { %8907 = vmatprep.subr.mxu0 %v11145_v0  ;;  %8912 = vmatprep.subr.mxu1 %v11145_v0  ;;  %v2215_v54 = vand.u32 4294901760, %v2214_v49  ;;  %v289_v49 = vld [vmem:[%s9819_s4 + $0x68] sm:$0xff] }
  0x7a   : > { %8903 = vmatmul.mubr.f32.vlgmr.msra.gmra.mxu1 %v1295_v52  ;;  %v10177_v52 = vand.u32 4294901760, %v2253_v46 }
  0x7b   : > { %8913 = vmatpush3.xpose.msra.mxu1 %v9970_v44  ;;  %8916 = vmatprep.mubr.msk.f32.mxu1 %vm9705_vm0, %v11145_v0 }
  0x7c   : > { %8908 = vmatpush3.xpose.msra.mxu0 %v10014_v56  ;;  %8914 = vmatprep.subr.mxu1 %v11145_v0 }
  0x7d   : > { %8919 = vmatprep.subr.mxu0 %v11145_v0 }
  0x7f   : > { %8910 = vmatmul.mubr.f32.vlgmr.msra.gmra.mxu0 %v9972_v45  ;;  %8915 = vmatpush3.xpose.msra.mxu1 %v9981_v47 }
  0x80   : > { %8920 = vmatpush3.xpose.msra.mxu0 %v10045_v63  ;;  %8923 = vmatprep.mubr.msk.f32.mxu0 %vm9705_vm0, %v11145_v0 }
  0x81   : > { %8921 = vmatprep.subr.mxu0 %v11145_v0  ;;  %8926 = vmatprep.subr.mxu1 %v11145_v0 }
  0x82   : > { %8917 = vmatmul.mubr.f32.vlgmr.msra.gmra.mxu1 %v9972_v45  ;;  %v10156_v45 = vsub.f32 %v284_v35, %v10135_v36 }
  0x83   : > { %8927 = vmatpush3.xpose.msra.mxu1 %v10099_v20  ;;  %8930 = vmatprep.mubr.msk.f32.mxu1 %vm9705_vm0, %v11145_v0 }
  0x84   : > { %8922 = vmatpush3.xpose.msra.mxu0 %v10056_v3  ;;  %8928 = vmatprep.subr.mxu1 %v11145_v0  ;;  %11174 = vst [vmem:[#allocation13_spill] sm:$0xff] %v10156_v45  ;;  %v10167_v50 = vand.u32 4294901760, %v10156_v45 }
  0x85   : > { %8933 = vmatprep.subr.mxu0 %v11145_v0 }
  0x86   : > { %11175 = vst [vmem:[#allocation14_spill] sm:$0xff] %v10167_v50  ;;  %v2260_v55 = vsub.f32 %v10156_v45, %v10167_v50 }
  0x87   : > { %8924 = vmatmul.mubr.f32.vlgmr.msra.gmra.mxu0 %v1756_v22  ;;  %8929 = vmatpush3.xpose.msra.mxu1 %v10108_v24 }
  0x88   : > { %8934 = vmatpush3.xpose.msra.mxu0 %v10059_v4  ;;  %8937 = vmatprep.mubr.msk.f32.mxu0 %vm9705_vm0, %v11145_v0  ;;  %v10186_v58 = vand.u32 4294901760, %v2260_v55 }
  0x89   : > { %8935 = vmatprep.subr.mxu0 %v11145_v0  ;;  %8940 = vmatprep.subr.mxu1 %v11145_v0 }
  0x8a   : > { %8931 = vmatmul.mubr.f32.vlgmr.msra.gmra.mxu1 %v10047_v1 }
  0x8b   : > { %8941 = vmatpush3.xpose.msra.mxu1 %v10045_v63  ;;  %8944 = vmatprep.mubr.msk.f32.mxu1 %vm9705_vm0, %v11145_v0 }
  0x8c   : > { %8936 = vmatpush3.xpose.msra.mxu0 %v10077_v13  ;;  %8942 = vmatprep.subr.mxu1 %v11145_v0 }
  0x8d   : > { %8947 = vmatprep.subr.mxu0 %v11145_v0 }
  0x8f   : > { %8938 = vmatmul.mubr.f32.vlgmr.msra.gmra.mxu0 %v10062_v7  ;;  %8943 = vmatpush3.xpose.msra.mxu1 %v10056_v3  ;;  %v10209_v7 = vand.u32 4294901760, %v286_v2 }
  0x90   : > { %8948 = vmatpush3.xpose.msra.mxu0 %v10073_v9  ;;  %8951 = vmatprep.mubr.msk.f32.mxu0 %vm9705_vm0, %v11145_v0 }
  0x91   : > { %8949 = vmatprep.subr.mxu0 %v11145_v0  ;;  %8954 = vmatprep.subr.mxu1 %v11145_v0  ;;  %11177 = vst [vmem:[#allocation16_spill] sm:$0xff] %v10209_v7  ;;  %v10230_v22 = vsub.f32 %v286_v2, %v10209_v7 }
  0x92   : > { %8945 = vmatmul.mubr.f32.vlgmr.msra.gmra.mxu1 %v1754_v11  ;;  %v10212_v11 = vsub.f32 %v287_v59, %v10198_v62  ;;  %v288_v59 = vld [vmem:[%s9819_s4 + $0x60] sm:$0xff] }
  0x93   : > { %8955 = vmatpush3.xpose.msra.mxu1 %v10045_v63  ;;  %8958 = vmatprep.mubr.msk.f32.mxu1 %vm9705_vm0, %v11145_v0  ;;  %11180 = vst [vmem:[#allocation19_spill] sm:$0xff] %v10230_v22  ;;  %v10241_v27 = vand.u32 4294901760, %v10230_v22  ;;  %v10286_v2 = vand.u32 4294901760, %v288_v59 }
  0x94   : > { %8950 = vmatpush3.xpose.msra.mxu0 %v10088_v17  ;;  %8956 = vmatprep.subr.mxu1 %v11145_v0  ;;  %11178 = vst [vmem:[#allocation17_spill] sm:$0xff] %v10212_v11  ;;  %v10226_v16 = vand.u32 4294901760, %v10212_v11 }
  0x95   : > { %8961 = vmatprep.subr.mxu0 %v11145_v0  ;;  %11181 = vst [vmem:[#allocation20_spill] sm:$0xff] %v10241_v27  ;;  %11186 = vst [vmem:[#allocation25_spill] sm:$0xff] %v10286_v2 }
  0x96   : > { %11179 = vst [vmem:[#allocation18_spill] sm:$0xff] %v10226_v16  ;;  %v2712_v23 = vsub.f32 %v10212_v11, %v10226_v16 }
  0x97   : > { %8952 = vmatmul.mubr.f32.vlgmr.msra.gmra.mxu0 %v10047_v1  ;;  %8957 = vmatpush3.xpose.msra.mxu1 %v10056_v3 }
  0x98   : > { %8962 = vmatpush3.xpose.msra.mxu0 %v10124_v31  ;;  %8965 = vmatprep.mubr.msk.f32.mxu0 %vm9705_vm0, %v11145_v0  ;;  %v10251_v35 = vand.u32 4294901760, %v2712_v23 }
  0x99   : > { %8963 = vmatprep.subr.mxu0 %v11145_v0  ;;  %8968 = vmatprep.subr.mxu1 %v11145_v0 }
  0x9a   : > { %8959 = vmatmul.mubr.f32.vlgmr.msra.gmra.mxu1 %v10047_v1  ;;  %v10200_v1 = vand.u32 4294901760, %v297_v61  ;;  %11182 = vst [vmem:[#allocation21_spill] sm:$0xff] %v10251_v35 }
  0x9b   : > { %8969 = vmatpush3.xpose.msra.mxu1 %v10177_v52  ;;  %8972 = vmatprep.mubr.msk.f32.mxu1 %vm9705_vm0, %v11145_v0 }
  0x9c   : > { %8964 = vmatpush3.xpose.msra.mxu0 %v10135_v36  ;;  %8970 = vmatprep.subr.mxu1 %v11145_v0  ;;  %v10215_v15 = vsub.f32 %v297_v61, %v10200_v1 }
  0x9d   : > { %8975 = vmatprep.subr.mxu0 %v11145_v0 }
  0x9e   : > { %v2672_v18 = vand.u32 4294901760, %v10215_v15 }
  0x9f   : > { %8966 = vmatmul.mubr.f32.vlgmr.msra.gmra.mxu0 %v2215_v54  ;;  %8971 = vmatpush3.xpose.msra.mxu1 %v10186_v58  ;;  %v298_v54 = vld [vmem:[%s9843_s7 + $0x6] sm:$0x1] }
  0xa0   : > { %8976 = vmatpush3.xpose.msra.mxu0 %v10138_v39  ;;  %8979 = vmatprep.mubr.msk.f32.mxu0 %vm9705_vm0, %v11145_v0  ;;  %v2673_v26 = vsub.f32 %v10215_v15, %v2672_v18  ;;  %v10274_v55 = vand.u32 4294901760, %v298_v54 }
  0xa1   : > { %8977 = vmatprep.subr.mxu0 %v11145_v0  ;;  %8982 = vmatprep.subr.mxu1 %v11145_v0 }
  0xa2   : > { %8973 = vmatmul.mubr.f32.vlgmr.msra.gmra.mxu1 %v10126_v33  ;;  %v10289_v23 = vsub.f32 %v298_v54, %v10274_v55 }
  0xa3   : > { %8983 = vmatpush3.xpose.msra.mxu1 %v10124_v31  ;;  %8986 = vmatprep.mubr.msk.f32.mxu1 %vm9705_vm0, %v11145_v0 }
  0xa4   : > { %8978 = vmatpush3.xpose.msra.mxu0 %v10156_v45  ;;  %8984 = vmatprep.subr.mxu1 %v11145_v0 }
  0xa5   : > { %8989 = vmatprep.subr.mxu0 %v11145_v0 }
  0xa7   : > { %8980 = vmatmul.mubr.f32.vlgmr.msra.gmra.mxu0 %v10141_v40  ;;  %8985 = vmatpush3.xpose.msra.mxu1 %v10135_v36  ;;  %v2674_v40 = vand.u32 4294901760, %v2673_v26  ;;  %v10303_v26 = vsub.f32 %v288_v59, %v10286_v2 }
  0xa8   : > { %8990 = vmatpush3.xpose.msra.mxu0 %v10152_v42  ;;  %8993 = vmatprep.mubr.msk.f32.mxu0 %vm9705_vm0, %v11145_v0 }
  0xa9   : > { %8991 = vmatprep.subr.mxu0 %v11145_v0  ;;  %8996 = vmatprep.subr.mxu1 %v11145_v0  ;;  %11188 = vst [vmem:[#allocation27_spill] sm:$0xff] %v10303_v26 }
  0xaa   : > { %8987 = vmatmul.mubr.f32.vlgmr.msra.gmra.mxu1 %v2213_v43  ;;  %v2719_v43 = vsub.f32 %v10230_v22, %v10241_v27 }
  0xab   : > { %8997 = vmatpush3.xpose.msra.mxu1 %v10124_v31  ;;  %9000 = vmatprep.mubr.msk.f32.mxu1 %vm9705_vm0, %v11145_v0 }
  0xac   : > { %8992 = vmatpush3.xpose.msra.mxu0 %v10167_v50  ;;  %8998 = vmatprep.subr.mxu1 %v11145_v0  ;;  %v10260_v46 = vand.u32 4294901760, %v2719_v43 }
  0xad   : > { %9003 = vmatprep.subr.mxu0 %v11145_v0 }
  0xae   : > { %11183 = vst [vmem:[#allocation22_spill] sm:$0xff] %v10260_v46 }
  0xaf   : > { %8994 = vmatmul.mubr.f32.vlgmr.msra.gmra.mxu0 %v10126_v33  ;;  %8999 = vmatpush3.xpose.msra.mxu1 %v10135_v36 }
  0xb0   : > { %9004 = vmatpush3.xpose.msra.mxu0 %v10198_v62  ;;  %9007 = vmatprep.mubr.msk.f32.mxu0 %vm9705_vm0, %v11145_v0 }
  0xb1   : > { %9005 = vmatprep.subr.mxu0 %v11145_v0  ;;  %9010 = vmatprep.subr.mxu1 %v11145_v0 }
  0xb2   : > { %9001 = vmatmul.mubr.f32.vlgmr.msra.gmra.mxu1 %v10126_v33  ;;  %v10272_v33 = vand.u32 4294901760, %v289_v49 }
  0xb3   : > { %9011 = vmatpush3.xpose.msra.mxu1 %v10251_v35  ;;  %9014 = vmatprep.mubr.msk.f32.mxu1 %vm9705_vm0, %v11145_v0 }
  0xb4   : > { %9006 = vmatpush3.xpose.msra.mxu0 %v10209_v7  ;;  %9012 = vmatprep.subr.mxu1 %v11145_v0  ;;  %11184 = vst [vmem:[#allocation23_spill] sm:$0xff] %v10272_v33  ;;  %v10284_v61 = vsub.f32 %v289_v49, %v10272_v33  ;;  %v10314_v49 = vand.u32 4294901760, %v10303_v26 }
  0xb5   : > { %9017 = vmatprep.subr.mxu0 %v11145_v0 }
  0xb6   : > { %11185 = vst [vmem:[#allocation24_spill] sm:$0xff] %v10284_v61  ;;  %11189 = vst [vmem:[#allocation28_spill] sm:$0xff] %v10314_v49  ;;  %v3178_v59 = vsub.f32 %v10303_v26, %v10314_v49 }
  0xb7   : > { %9008 = vmatmul.mubr.f32.vlgmr.msra.gmra.mxu0 %v2674_v40  ;;  %9013 = vmatpush3.xpose.msra.mxu1 %v10260_v46  ;;  %v3131_v40 = vand.u32 4294901760, %v10289_v23 }
  0xb8   : > { %9018 = vmatpush3.xpose.msra.mxu0 %v10212_v11  ;;  %9021 = vmatprep.mubr.msk.f32.mxu0 %vm9705_vm0, %v11145_v0  ;;  %v10486_v11 = vld [vmem:[%s9857_s10 + $0x7] sm:$0x1] }
  0xb9   : > { %9019 = vmatprep.subr.mxu0 %v11145_v0  ;;  %9024 = vmatprep.subr.mxu1 %v11145_v0  ;;  %v3132_v54 = vsub.f32 %v10289_v23, %v3131_v40 }
  0xba   : > { %9015 = vmatmul.mubr.f32.vlgmr.msra.gmra.mxu1 %v10200_v1 }
  0xbb   : > { %9025 = vmatpush3.xpose.msra.mxu1 %v10198_v62  ;;  %9028 = vmatprep.mubr.msk.f32.mxu1 %vm9705_vm0, %v11145_v0 }
  0xbc   : > { %9020 = vmatpush3.xpose.msra.mxu0 %v10230_v22  ;;  %9026 = vmatprep.subr.mxu1 %v11145_v0 }
  0xbd   : > { %9031 = vmatprep.subr.mxu0 %v11145_v0 }
  0xbf   : > { %9022 = vmatmul.mubr.f32.vlgmr.msra.gmra.mxu0 %v10215_v15  ;;  %9027 = vmatpush3.xpose.msra.mxu1 %v10209_v7  ;;  %v10300_v15 = vand.u32 4294901760, %v10284_v61 }
  0xc0   : > { %9032 = vmatpush3.xpose.msra.mxu0 %v10226_v16  ;;  %9035 = vmatprep.mubr.msk.f32.mxu0 %vm9705_vm0, %v11145_v0  ;;  %v10334_v16 = vand.u32 4294901760, %v3178_v59 }
  0xc1   : > { %9033 = vmatprep.subr.mxu0 %v11145_v0  ;;  %11187 = vst [vmem:[#allocation26_spill] sm:$0xff] %v10300_v15  ;;  %9038 = vmatprep.subr.mxu1 %v11145_v0  ;;  %v3171_v43 = vsub.f32 %v10284_v61, %v10300_v15 }
  0xc2   : > { %9029 = vmatmul.mubr.f32.vlgmr.msra.gmra.mxu1 %v2672_v18  ;;  %11191 = vst [vmem:[#allocation30_spill] sm:$0xff] %v10334_v16 }
  0xc3   : > { %9039 = vmatpush3.xpose.msra.mxu1 %v10198_v62  ;;  %9042 = vmatprep.mubr.msk.f32.mxu1 %vm9705_vm0, %v11145_v0  ;;  %v10325_v18 = vand.u32 4294901760, %v3171_v43  ;;  %v291_v43 = vld [vmem:[%s9819_s4 + $0x78] sm:$0xff] }
  0xc4   : > { %9034 = vmatpush3.xpose.msra.mxu0 %v10241_v27  ;;  %9040 = vmatprep.subr.mxu1 %v11145_v0  ;;  %v3133_v27 = vand.u32 4294901760, %v3132_v54  ;;  %v299_v54 = vld [vmem:[%s9843_s7 + $0x7] sm:$0x1] }
  0xc5   : > { %9045 = vmatprep.subr.mxu0 %v11145_v0  ;;  %11190 = vst [vmem:[#allocation29_spill] sm:$0xff] %v10325_v18  ;;  %v10348_v59 = vand.u32 4294901760, %v299_v54 }
  0xc7   : > { %9036 = vmatmul.mubr.f32.vlgmr.msra.gmra.mxu0 %v10200_v1  ;;  %9041 = vmatpush3.xpose.msra.mxu1 %v10209_v7 }
  0xc8   : > { %9046 = vmatpush3.xpose.msra.mxu0 %v10272_v33  ;;  %9049 = vmatprep.mubr.msk.f32.mxu0 %vm9705_vm0, %v11145_v0 }
  0xc9   : > { %9047 = vmatprep.subr.mxu0 %v11145_v0  ;;  %9052 = vmatprep.subr.mxu1 %v11145_v0 }
  0xca   : > { %9043 = vmatmul.mubr.f32.vlgmr.msra.gmra.mxu1 %v10200_v1  ;;  %v10346_v1 = vand.u32 4294901760, %v291_v43 }
  0xcb   : > { %9053 = vmatpush3.xpose.msra.mxu1 %v10325_v18  ;;  %9056 = vmatprep.mubr.msk.f32.mxu1 %vm9705_vm0, %v11145_v0  ;;  %v3589_v18 = vsub.f32 %v299_v54, %v10348_v59 }
  0xcc   : > { %9048 = vmatpush3.xpose.msra.mxu0 %v10286_v2  ;;  %9054 = vmatprep.subr.mxu1 %v11145_v0  ;;  %11192 = vst [vmem:[#allocation31_spill] sm:$0xff] %v10346_v1 }
  0xcd   : > { %9059 = vmatprep.subr.mxu0 %v11145_v0  ;;  %v3590_v54 = vand.u32 4294901760, %v3589_v18 }
  0xcf   : > { %9050 = vmatmul.mubr.f32.vlgmr.msra.gmra.mxu0 %v3133_v27  ;;  %9055 = vmatpush3.xpose.msra.mxu1 %v10334_v16  ;;  %v290_v27 = vld [vmem:[%s9819_s4 + $0x70] sm:$0xff]  ;;  %s9619_s4 = scalar_lea.vmem %s11066_s19, 256 }
  0xd0   : > { %9060 = vmatpush3.xpose.msra.mxu0 %v10284_v61  ;;  %9063 = vmatprep.mubr.msk.f32.mxu0 %vm9705_vm0, %v11145_v0  ;;  %v10358_v61 = vsub.f32 %v291_v43, %v10346_v1  ;;  %v10360_v16 = vand.u32 4294901760, %v290_v27  ;;  %p9620_p12 = scmp.ne.s32.totalorder %s11066_s19, %s9619_s4  ;;  %p9627_p5 = scmp.lt.s32.totalorder %s9625_s24, %s9619_s4 }
  0xd1   : > { %9061 = vmatprep.subr.mxu0 %v11145_v0  ;;  %9066 = vmatprep.subr.mxu1 %v11145_v0 }
  0xd2   : > { %9057 = vmatmul.mubr.f32.vlgmr.msra.gmra.mxu1 %v10274_v55  ;;  %11193 = vst [vmem:[#allocation32_spill] sm:$0xff] %v10358_v61  ;;  %11194 = vst [vmem:[#allocation33_spill] sm:$0xff] %v10360_v16  ;;  %v10375_v43 = vsub.f32 %v290_v27, %v10360_v16  ;;  %v3591_v27 = vsub.f32 %v3589_v18, %v3590_v54  ;;  %p9621_p0 = pnand %p9620_p12, %p9782_p9  ;;  %p9628_p6 = por %p9627_p5, %p9626_p3 }
  0xd3   : > { %9067 = vmatpush3.xpose.msra.mxu1 %v10272_v33  ;;  %9070 = vmatprep.mubr.msk.f32.mxu1 %vm9705_vm0, %v11145_v0 }
  0xd4   : > { %9062 = vmatpush3.xpose.msra.mxu0 %v10303_v26  ;;  %9068 = vmatprep.subr.mxu1 %v11145_v0  ;;  %11196 = vst [vmem:[#allocation35_spill] sm:$0xff] %v10375_v43  ;;  %v10385_v26 = vand.u32 4294901760, %v10375_v43  ;;  %p9622_p1 = pneg %p9621_p0 }
  0xd5   : > { %9073 = vmatprep.subr.mxu0 %v11145_v0 }
  0xd6   : > { %11197 = vst [vmem:[#allocation36_spill] sm:$0xff] %v10385_v26  ;;  %p9629_p7 = pnand %p9628_p6, %p9622_p1 }
  0xd7   : > { %9064 = vmatmul.mubr.f32.vlgmr.msra.gmra.mxu0 %v10289_v23  ;;  %9069 = vmatpush3.xpose.msra.mxu1 %v10286_v2  ;;  %v10372_v23 = vand.u32 4294901760, %v10358_v61 }
  0xd8   : > { %9074 = vmatpush3.xpose.msra.mxu0 %v10300_v15  ;;  %9077 = vmatprep.mubr.msk.f32.mxu0 %vm9705_vm0, %v11145_v0 }
  0xd9   : > { %9075 = vmatprep.subr.mxu0 %v11145_v0  ;;  %11195 = vst [vmem:[#allocation34_spill] sm:$0xff] %v10372_v23  ;;  %9080 = vmatprep.subr.mxu1 %v11145_v0  ;;  %v3630_v15 = vsub.f32 %v10358_v61, %v10372_v23 }
  0xda   : > { %9071 = vmatmul.mubr.f32.vlgmr.msra.gmra.mxu1 %v3131_v40 }
  0xdb   : > { %9081 = vmatpush3.xpose.msra.mxu1 %v10272_v33  ;;  %9084 = vmatprep.mubr.msk.f32.mxu1 %vm9705_vm0, %v11145_v0  ;;  %v10395_v40 = vand.u32 4294901760, %v3630_v15  ;;  %v3592_v33 = vand.u32 4294901760, %v3591_v27 }
  0xdc   : > { %9076 = vmatpush3.xpose.msra.mxu0 %v10314_v49  ;;  %9082 = vmatprep.subr.mxu1 %v11145_v0  ;;  %v3637_v49 = vsub.f32 %v10375_v43, %v10385_v26 }
  0xdd   : > { %9087 = vmatprep.subr.mxu0 %v11145_v0  ;;  %11198 = vst [vmem:[#allocation37_spill] sm:$0xff] %v10395_v40 }
  0xde   : > { %v10404_v22 = vand.u32 4294901760, %v3637_v49  ;;  %v3981_v49 = vlaneseq }
  0xdf   : > { %9078 = vmatmul.mubr.f32.vlgmr.msra.gmra.mxu0 %v10274_v55  ;;  %9083 = vmatpush3.xpose.msra.mxu1 %v10286_v2 }
  0xe0   : > { %9088 = vmatpush3.xpose.msra.mxu0 %v10346_v1  ;;  %9091 = vmatprep.mubr.msk.f32.mxu0 %vm9705_vm0, %v11145_v0  ;;  %11199 = vst [vmem:[#allocation38_spill] sm:$0xff] %v10404_v22 }
  0xe1   : > { %9089 = vmatprep.subr.mxu0 %v11145_v0  ;;  %9094 = vmatprep.subr.mxu1 %v11145_v0 }
  0xe2   : > { %9085 = vmatmul.mubr.f32.vlgmr.msra.gmra.mxu1 %v10274_v55 }
  0xe3   : > { %9095 = vmatpush3.xpose.msra.mxu1 %v10395_v40  ;;  %9098 = vmatprep.mubr.msk.f32.mxu1 %vm9705_vm0, %v11145_v0  ;;  %v10453_v40 = vand.u32 127, %v3981_v49 }
  0xe4   : > { %9090 = vmatpush3.xpose.msra.mxu0 %v10360_v16  ;;  %9096 = vmatprep.subr.mxu1 %v11145_v0 }
  0xe5   : > { %9101 = vmatprep.subr.mxu0 %v11145_v0 }
  0xe7   : > { %9092 = vmatmul.mubr.f32.vlgmr.msra.gmra.mxu0 %v3592_v33  ;;  %9097 = vmatpush3.xpose.msra.mxu1 %v10404_v22 }
  0xe8   : > { %9102 = vmatpush3.xpose.msra.mxu0 %v10358_v61  ;;  %9105 = vmatprep.mubr.msk.f32.mxu0 %vm9705_vm0, %v11145_v0 }
  0xe9   : > { %9103 = vmatprep.subr.mxu0 %v11145_v0  ;;  %9108 = vmatprep.subr.mxu1 %v11145_v0 }
  0xea   : > { %9099 = vmatmul.mubr.f32.vlgmr.msra.gmra.mxu1 %v10348_v59 }
  0xeb   : > { %9109 = vmatpush3.xpose.msra.mxu1 %v10346_v1  ;;  %9112 = vmatprep.mubr.msk.f32.mxu1 %vm9705_vm0, %v11145_v0 }
  0xec   : > { %9104 = vmatpush3.xpose.msra.mxu0 %v10375_v43  ;;  %9110 = vmatprep.subr.mxu1 %v11145_v0 }
  0xed   : > { %9115 = vmatprep.subr.mxu0 %v11145_v0 }
  0xef   : > { %9106 = vmatmul.mubr.f32.vlgmr.msra.gmra.mxu0 %v3589_v18  ;;  %9111 = vmatpush3.xpose.msra.mxu1 %v10360_v16 }
  0xf0   : > { %9116 = vmatpush3.xpose.msra.mxu0 %v10372_v23  ;;  %9119 = vmatprep.mubr.msk.f32.mxu0 %vm9705_vm0, %v11145_v0 }
  0xf1   : > { %9117 = vmatprep.subr.mxu0 %v11145_v0  ;;  %9122 = vmatprep.subr.mxu1 %v11145_v0 }
  0xf2   : > { %9113 = vmatmul.mubr.f32.vlgmr.msra.gmra.mxu1 %v3590_v54 }
  0xf3   : > { %9123 = vmatpush3.xpose.msra.mxu1 %v10346_v1  ;;  %9126 = vmatprep.mubr.msk.f32.mxu1 %vm9705_vm0, %v11145_v0  ;;  %v3987_v1 = vpop.permute.xlu0 %3986 }
  0xf4   : > { %9118 = vmatpush3.xpose.msra.mxu0 %v10385_v26  ;;  %9124 = vmatprep.subr.mxu1 %v11145_v0  ;;  %v3989_v26 = vshrl.u32 %v3981_v49, 7 }
  0xf5   : > { %9129 = vmatprep.subr.mxu0 %v11145_v0 }
  0xf6   : > { %v10450_v23 = vsub.s32 0, %v3989_v26 }
  0xf7   : > { %9120 = vmatmul.mubr.f32.vlgmr.msra.gmra.mxu0 %v10348_v59  ;;  %9125 = vmatpush3.xpose.msra.mxu1 %v10360_v16 }
  0xf8   : > { %9130 = vmatpush3.msra.mxu0 %v9848_v5  ;;  %9133 = vmatprep.mubr.msk.f32.mxu0 %vm9705_vm0, %v11145_v0 }
  0xf9   : > { %9131 = vmatprep.subr.mxu0 %v11145_v0  ;;  %9136 = vmatprep.subr.mxu1 %v11145_v0 }
  0xfa   : > { %9132 = vmatpush3.msra.mxu0 %v9850_v6  ;;  %9127 = vmatmul.mubr.f32.vlgmr.msra.gmra.mxu1 %v10348_v59 }
  0xfb   : > { %9143 = vmatprep.subr.mxu0 %v11145_v0  ;;  %9137 = vmatpush3.msra.mxu1 %v9882_v19 }
  0xfc   : > { %9140 = vmatprep.mubr.msk.f32.mxu1 %vm9705_vm0, %v11145_v0  ;;  %9138 = vmatprep.subr.mxu1 %v11145_v0 }
  0xfd   : > { %9139 = vmatpush3.msra.mxu1 %v9885_v21  ;;  %v3991_v21 = vrot.slane %v3987_v1, %v10450_v23 }
  0xfe   : > { %9150 = vmatprep.subr.mxu1 %v11145_v0 }
  0xff   : > { %v381_v33 = vpop.f32.mrf.mxu0  ;;  %vm4041_vm1 = vcmp.lt.s32.totalorder %v10453_v40, %v3991_v21 }
 0x101   : > { %v8799_v55 = vpop.f32.mrf.mxu0 }
 0x102   : > { %v462_v15 = vpop.f32.mrf.mxu1 }
 0x103   : > { %v463_v59 = vadd.f32 %v462_v15, %v381_v33 }
 0x104   : > { %v8806_v54 = vpop.f32.mrf.mxu1 }
 0x107   : > { %v538_v18 = vpop.f32.mrf.mxu0 }
 0x108   : > { %v539_v43 = vadd.f32 %v538_v18, %v463_v59 }
 0x109   : > { %v8813_v27 = vpop.f32.mrf.mxu0 }
 0x10a   : > { %v613_v19 = vpop.f32.mrf.mxu1 }
 0x10b   : > { %v614_v22 = vadd.f32 %v613_v19, %v539_v43  ;;  %v9707_v43 = vmov -1e+32  }
 0x10c   : > { %v8820_v16 = vpop.f32.mrf.mxu1  ;;  %252 = vst.msk [vmem:[#allocation2] sm:$0x1] %vm251_vm3, %v9707_v43  ;;  %253 = vst.msk [vmem:[#allocation2 + $0x1] sm:$0x1] %vm251_vm3, %v9707_v43 }
 0x10d   : > { %254 = vst.msk [vmem:[#allocation2 + $0x2] sm:$0x1] %vm251_vm3, %v9707_v43  ;;  %255 = vst.msk [vmem:[#allocation2 + $0x3] sm:$0x1] %vm251_vm3, %v9707_v43 }
 0x10e   : > { %256 = vst.msk [vmem:[#allocation2 + $0x4] sm:$0x1] %vm251_vm3, %v9707_v43  ;;  %257 = vst.msk [vmem:[#allocation2 + $0x5] sm:$0x1] %vm251_vm3, %v9707_v43 }
 0x10f   : > { %v690_v61 = vpop.f32.mrf.mxu0  ;;  %258 = vst.msk [vmem:[#allocation2 + $0x6] sm:$0x1] %vm251_vm3, %v9707_v43  ;;  %259 = vst.msk [vmem:[#allocation2 + $0x7] sm:$0x1] %vm251_vm3, %v9707_v43 }
 0x110   : > { %v691_v0 = vadd.f32 %v690_v61, %v614_v22 }
 0x111   : > { %v8827_v55 = vpop.f32.mrf.mxu0 }
 0x112   : > { %v763_v2 = vpop.f32.mrf.mxu1 }
 0x113   : > { %v764_v54 = vadd.f32 %v763_v2, %v691_v0  ;;  %v11200_v0 = vmov 0.0  }
 0x114   : > { %v8834_v26 = vpop.f32.mrf.mxu1  ;;  %260 = vst.msk [vmem:[#allocation3] sm:$0x1] %vm251_vm3, %v11200_v0  ;;  %261 = vst.msk [vmem:[#allocation3 + $0x1] sm:$0x1] %vm251_vm3, %v11200_v0 }
 0x115   : > { %v10456_v15 = vsel %vm4041_vm1, %v764_v54, -1e+32  ;;  %262 = vst.msk [vmem:[#allocation3 + $0x2] sm:$0x1] %vm251_vm3, %v11200_v0  ;;  %263 = vst.msk [vmem:[#allocation3 + $0x3] sm:$0x1] %vm251_vm3, %v11200_v0  ;;  %v3994_v26 = vpop.permute.xlu0 %3993 }
 0x116   : > { %v4066_v16 = vsel %vm4065_vm2, %v10456_v15, -inf  ;;  %264 = vst.msk [vmem:[#allocation3 + $0x4] sm:$0x1] %vm251_vm3, %v11200_v0  ;;  %265 = vst.msk [vmem:[#allocation3 + $0x5] sm:$0x1] %vm251_vm3, %v11200_v0 }
 0x117   : > { %v840_v33 = vpop.f32.mrf.mxu0  ;;  %4067 = vmax.xlane.f32.xlu0 %v4066_v16  ;;  %266 = vst.msk [vmem:[#allocation3 + $0x6] sm:$0x1] %vm251_vm3, %v11200_v0  ;;  %267 = vst.msk [vmem:[#allocation3 + $0x7] sm:$0x1] %vm251_vm3, %v11200_v0 }
 0x119   : > { %v8841_v18 = vpop.f32.mrf.mxu0 }
 0x11a   : > { %v921_v22 = vpop.f32.mrf.mxu1  ;;  %v3998_v18 = vrot.slane %v3994_v26, %v10450_v23 }
 0x11b   : > { %v922_v49 = vadd.f32 %v921_v22, %v840_v33 }
 0x11c   : > { %v8848_v2 = vpop.f32.mrf.mxu1  ;;  %vm4042_vm4 = vcmp.lt.s32.totalorder %v10453_v40, %v3998_v18 }
 0x11f   : > { %v997_v61 = vpop.f32.mrf.mxu0 }
 0x120   : > { %v998_v59 = vadd.f32 %v997_v61, %v922_v49 }
 0x121   : > { %v8855_v1 = vpop.f32.mrf.mxu0 }
 0x122   : > { %v1072_v27 = vpop.f32.mrf.mxu1 }
 0x123   : > { %v1073_v21 = vadd.f32 %v1072_v27, %v998_v59 }
 0x124   : > { %v8862_v55 = vpop.f32.mrf.mxu1 }
 0x127   : > { %v1149_v19 = vpop.f32.mrf.mxu0 }
 0x128   : > { %v1150_v16 = vadd.f32 %v1149_v19, %v1073_v21 }
 0x129   : > { %v8869_v54 = vpop.f32.mrf.mxu0 }
 0x12a   : > { %v1222_v43 = vpop.f32.mrf.mxu1 }
 0x12b   : > { %v1223_v7 = vadd.f32 %v1222_v43, %v1150_v16 }
 0x12c   : > { %v8876_v46 = vpop.f32.mrf.mxu1 }
 0x12d   : > { %4035 = vperm.xlu0 %9535, %v10486_v11   ;;  %v10490_v33 = vsel %vm4042_vm4, %v1223_v7, -1e+32  ;;  %v4001_v46 = vpop.permute.xlu1 %4000 }
 0x12e   : > { %v4069_v61 = vsel %vm4065_vm2, %v10490_v33, -inf  ;;  %v4005_v7 = vrot.slane %v4001_v46, %v10450_v23 }
 0x12f   : > { %v1299_v62 = vpop.f32.mrf.mxu0  ;;  %4070 = vmax.xlane.f32.xlu1 %v4069_v61 }
 0x130   : > { %vm4043_vm5 = vcmp.lt.s32.totalorder %v10453_v40, %v4005_v7 }
 0x131   : > { %v8883_v22 = vpop.f32.mrf.mxu0 }
 0x132   : > { %v1380_v2 = vpop.f32.mrf.mxu1 }
 0x133   : > { %v1381_v59 = vadd.f32 %v1380_v2, %v1299_v62 }
 0x134   : > { %v8890_v49 = vpop.f32.mrf.mxu1 }
 0x137   : > { %v1456_v1 = vpop.f32.mrf.mxu0 }
 0x138   : > { %v1457_v55 = vadd.f32 %v1456_v1, %v1381_v59 }
 0x139   : > { %v8897_v27 = vpop.f32.mrf.mxu0 }
 0x13a   : > { %v1531_v19 = vpop.f32.mrf.mxu1 }
 0x13b   : > { %v1532_v26 = vadd.f32 %v1531_v19, %v1457_v55 }
 0x13c   : > { %v8904_v54 = vpop.f32.mrf.mxu1 }
 0x13d   : > { %v4008_v54 = vpop.permute.xlu1 %4007 }
 0x13f   : > { %v1608_v21 = vpop.f32.mrf.mxu0 }
 0x140   : > { %v1609_v16 = vadd.f32 %v1608_v21, %v1532_v26 }
 0x141   : > { %v8911_v18 = vpop.f32.mrf.mxu0 }
 0x142   : > { %v1681_v43 = vpop.f32.mrf.mxu1 }
 0x143   : > { %v1682_v22 = vadd.f32 %v1681_v43, %v1609_v16 }
 0x144   : > { %v8918_v50 = vpop.f32.mrf.mxu1 }
 0x145   : > { %v10496_v35 = vsel %vm4043_vm5, %v1682_v22, -1e+32  ;;  %v4012_v50 = vrot.slane %v4008_v54, %v10450_v23 }
 0x146   : > { %v4072_v62 = vsel %vm4065_vm2, %v10496_v35, -inf }
 0x147   : > { %v1758_v61 = vpop.f32.mrf.mxu0  ;;  %4073 = vmax.xlane.f32.xlu1 %v4072_v62  ;;  %vm4044_vm6 = vcmp.lt.s32.totalorder %v10453_v40, %v4012_v50 }
 0x149   : > { %v8925_v49 = vpop.f32.mrf.mxu0 }
 0x14a   : > { %v1839_v2 = vpop.f32.mrf.mxu1 }
 0x14b   : > { %v1840_v19 = vadd.f32 %v1839_v2, %v1758_v61 }
 0x14c   : > { %v8932_v27 = vpop.f32.mrf.mxu1 }
 0x14f   : > { %v1915_v1 = vpop.f32.mrf.mxu0 }
 0x150   : > { %v1916_v21 = vadd.f32 %v1915_v1, %v1840_v19 }
 0x151   : > { %v8939_v59 = vpop.f32.mrf.mxu0 }
 0x152   : > { %v1990_v55 = vpop.f32.mrf.mxu1 }
 0x153   : > { %v1991_v18 = vadd.f32 %v1990_v55, %v1916_v21 }
 0x154   : > { %v8946_v26 = vpop.f32.mrf.mxu1 }
 0x157   : > { %v2067_v46 = vpop.f32.mrf.mxu0 }
 0x158   : > { %v2068_v16 = vadd.f32 %v2067_v46, %v1991_v18  ;;  %v4015_v18 = vpop.permute.xlu0 %4014 }
 0x159   : > { %v8953_v7 = vpop.f32.mrf.mxu0 }
 0x15a   : > { %v2140_v43 = vpop.f32.mrf.mxu1 }
 0x15b   : > { %v2141_v22 = vadd.f32 %v2140_v43, %v2068_v16  ;;  %v4019_v16 = vrot.slane %v4015_v18, %v10450_v23 }
 0x15c   : > { %v8960_v62 = vpop.f32.mrf.mxu1 }
 0x15d   : > { %v10502_v42 = vsel %vm4044_vm6, %v2141_v22, -1e+32  ;;  %vm4045_vm7 = vcmp.lt.s32.totalorder %v10453_v40, %v4019_v16 }
 0x15e   : > { %v4075_v61 = vsel %vm4065_vm2, %v10502_v42, -inf }
 0x15f   : > { %v2217_v49 = vpop.f32.mrf.mxu0  ;;  %4076 = vmax.xlane.f32.xlu1 %v4075_v61 }
 0x161   : > { %v8967_v27 = vpop.f32.mrf.mxu0 }
 0x162   : > { %v2298_v2 = vpop.f32.mrf.mxu1 }
 0x163   : > { %v2299_v55 = vadd.f32 %v2298_v2, %v2217_v49 }
 0x164   : > { %v8974_v59 = vpop.f32.mrf.mxu1 }
 0x167   : > { %v2374_v1 = vpop.f32.mrf.mxu0 }
 0x168   : > { %v2375_v46 = vadd.f32 %v2374_v1, %v2299_v55 }
 0x169   : > { %v8981_v19 = vpop.f32.mrf.mxu0 }
 0x16a   : > { %v2449_v21 = vpop.f32.mrf.mxu1 }
 0x16b   : > { %v2450_v7 = vadd.f32 %v2449_v21, %v2375_v46 }
 0x16c   : > { %v8988_v26 = vpop.f32.mrf.mxu1 }
 0x16f   : > { %v2526_v54 = vpop.f32.mrf.mxu0 }
 0x170   : > { %v2527_v43 = vadd.f32 %v2526_v54, %v2450_v7 }
 0x171   : > { %v8995_v50 = vpop.f32.mrf.mxu0 }
 0x172   : > { %v2599_v22 = vpop.f32.mrf.mxu1  ;;  %v4022_v50 = vpop.permute.xlu1 %4021 }
 0x173   : > { %v2600_v62 = vadd.f32 %v2599_v22, %v2527_v43  ;;  %v4026_v16 = vrot.slane %v4022_v50, %v10450_v23 }
 0x174   : > { %v9002_v45 = vpop.f32.mrf.mxu1 }
 0x175   : > { %v10508_v61 = vsel %vm4045_vm7, %v2600_v62, -1e+32  ;;  %vm4046_vm8 = vcmp.lt.s32.totalorder %v10453_v40, %v4026_v16  ;;  %v10518_v16 = vld [vmem:[#allocation2] sm:$0x1] }
 0x176   : > { %v4078_v49 = vsel %vm4065_vm2, %v10508_v61, -inf }
 0x177   : > { %v2676_v27 = vpop.f32.mrf.mxu0  ;;  %4079 = vmax.xlane.f32.xlu1 %v4078_v49 }
 0x179   : > { %v9009_v59 = vpop.f32.mrf.mxu0 }
 0x17a   : > { %v2757_v2 = vpop.f32.mrf.mxu1 }
 0x17b   : > { %v2758_v21 = vadd.f32 %v2757_v2, %v2676_v27 }
 0x17c   : > { %v9016_v19 = vpop.f32.mrf.mxu1 }
 0x17f   : > { %v2833_v1 = vpop.f32.mrf.mxu0 }
 0x180   : > { %v2834_v54 = vadd.f32 %v2833_v1, %v2758_v21 }
 0x181   : > { %v9023_v55 = vpop.f32.mrf.mxu0 }
 0x182   : > { %v2908_v46 = vpop.f32.mrf.mxu1 }
 0x183   : > { %v2909_v7 = vadd.f32 %v2908_v46, %v2834_v54 }
 0x184   : > { %v9030_v18 = vpop.f32.mrf.mxu1 }
 0x187   : > { %v2985_v26 = vpop.f32.mrf.mxu0 }
 0x188   : > { %v2986_v43 = vadd.f32 %v2985_v26, %v2909_v7 }
 0x189   : > { %v9037_v45 = vpop.f32.mrf.mxu0 }
 0x18a   : > { %v3058_v22 = vpop.f32.mrf.mxu1 }
 0x18b   : > { %v3059_v62 = vadd.f32 %v3058_v22, %v2986_v43 }
 0x18c   : > { %v9044_v39 = vpop.f32.mrf.mxu1 }
 0x18d   : > { %v10514_v49 = vsel %vm4046_vm8, %v3059_v62, -1e+32  ;;  %v4029_v39 = vpop.permute.xlu1 %4028 }
 0x18e   : > { %v4081_v27 = vsel %vm4065_vm2, %v10514_v49, -inf  ;;  %v4033_v22 = vrot.slane %v4029_v39, %v10450_v23 }
 0x18f   : > { %v3135_v59 = vpop.f32.mrf.mxu0  ;;  %4082 = vmax.xlane.f32.xlu1 %v4081_v27 }
 0x190   : > { %vm4047_vm9 = vcmp.lt.s32.totalorder %v10453_v40, %v4033_v22  ;;  %v10534_v22 = vld [vmem:[#allocation2 + $0x1] sm:$0x1] }
 0x191   : > { %v9051_v19 = vpop.f32.mrf.mxu0 }
 0x192   : > { %v3216_v2 = vpop.f32.mrf.mxu1 }
 0x193   : > { %v3217_v1 = vadd.f32 %v3216_v2, %v3135_v59 }
 0x194   : > { %v9058_v21 = vpop.f32.mrf.mxu1 }
 0x197   : > { %v3292_v55 = vpop.f32.mrf.mxu0 }
 0x198   : > { %v3293_v54 = vadd.f32 %v3292_v55, %v3217_v1 }
 0x199   : > { %v9065_v46 = vpop.f32.mrf.mxu0 }
 0x19a   : > { %v3367_v26 = vpop.f32.mrf.mxu1 }
 0x19b   : > { %v3368_v18 = vadd.f32 %v3367_v26, %v3293_v54 }
 0x19c   : > { %v9072_v45 = vpop.f32.mrf.mxu1 }
 0x19f   : > { %v3444_v7 = vpop.f32.mrf.mxu0 }
 0x1a0   : > { %v3445_v43 = vadd.f32 %v3444_v7, %v3368_v18  ;;  %v4068_v62 = vpop.xlane.xlu0 %4067 }
 0x1a1   : > { %v9079_v50 = vpop.f32.mrf.mxu0  ;;  %v10522_v19 = vmax.f32 %v10518_v16, %v4068_v62 }
 0x1a2   : > { %v3517_v59 = vpop.f32.mrf.mxu1 }
 0x1a3   : > { %11201 = vst [vmem:[#allocation39_spill] sm:$0xff] %v10522_v19  ;;  %4275 = vst.msk [vmem:[#allocation2] sm:$0x1] %vm251_vm3, %v10522_v19  ;;  %v3518_v2 = vadd.f32 %v3517_v59, %v3445_v43  ;;  %4124 = vperm.xlu1 %9536, %v10522_v19  }
 0x1a4   : > { %v9086_v55 = vpop.f32.mrf.mxu1 }
 0x1a5   : > { %v10530_v21 = vsel %vm4047_vm9, %v3518_v2, -1e+32 }
 0x1a6   : > { %11202 = vst [vmem:[#allocation40_spill] sm:$0xff] %v10530_v21  ;;  %v4084_v54 = vsel %vm4065_vm2, %v10530_v21, -inf }
 0x1a7   : > { %v3594_v1 = vpop.f32.mrf.mxu0  ;;  %4085 = vmax.xlane.f32.xlu0 %v4084_v54 }
 0x1a8   : > { %v4036_v21 = vpop.permute.xlu0 %4035 }
 0x1a9   : > { %v9093_v46 = vpop.f32.mrf.mxu0 }
 0x1aa   : > { %v3675_v26 = vpop.f32.mrf.mxu1 }
 0x1ab   : > { %v3676_v39 = vadd.f32 %v3675_v26, %v3594_v1 }
 0x1ac   : > { %v9100_v7 = vpop.f32.mrf.mxu1 }
 0x1ad   : > { %v4040_v7 = vrot.slane %v4036_v21, %v10450_v23  ;;  %v10562_v21 = vld [vmem:[#allocation2 + $0x3] sm:$0x1] }
 0x1af   : > { %v3751_v18 = vpop.f32.mrf.mxu0  ;;  %vm4048_vm10 = vcmp.lt.s32.totalorder %v10453_v40, %v4040_v7 }
 0x1b0   : > { %v3752_v43 = vadd.f32 %v3751_v18, %v3676_v39  ;;  %v9585_v18 = vld [vmem:[%s9857_s10] sm:$0x1]  ;;  %v9586_v39 = vld [vmem:[%s9857_s10 + $0x1] sm:$0x1] }
 0x1b1   : > { %v9107_v45 = vpop.f32.mrf.mxu0 }
 0x1b2   : > { %v3826_v50 = vpop.f32.mrf.mxu1 }
 0x1b3   : > { %v3827_v2 = vadd.f32 %v3826_v50, %v3752_v43  ;;  %v8490_v50 = vadd.s32 4294967295, %v9586_v39 }
 0x1b4   : > { %v9114_v59 = vpop.f32.mrf.mxu1 }
 0x1b5   : > { %v10552_v59 = vld [vmem:[#allocation2 + $0x2] sm:$0x1] }
 0x1b7   : > { %v3903_v62 = vpop.f32.mrf.mxu0 }
 0x1b8   : > { %v4071_v55 = vpop.xlane.xlu1 %4070  ;;  %v3904_v19 = vadd.f32 %v3903_v62, %v3827_v2 }
 0x1b9   : > { %v9121_v27 = vpop.f32.mrf.mxu0  ;;  %v10537_v46 = vmax.f32 %v10534_v22, %v4071_v55 }
 0x1ba   : > { %v3976_v54 = vpop.f32.mrf.mxu1  ;;  %v8489_v27 = vadd.s32 4294967295, %v9585_v18  ;;  %v9587_v18 = vld [vmem:[%s9857_s10 + $0x2] sm:$0x1] }
 0x1bb   : > { %11203 = vst [vmem:[#allocation41_spill] sm:$0xff] %v10537_v46  ;;  %4276 = vst.msk [vmem:[#allocation2 + $0x1] sm:$0x1] %vm251_vm3, %v10537_v46  ;;  %v3977_v45 = vadd.f32 %v3976_v54, %v3904_v19  ;;  %v8495_v19 = vadd.s32 4294967295, %v10115_v30 }
 0x1bc   : > { %v9128_v26 = vpop.f32.mrf.mxu1 }
 0x1bd   : > { %4133 = vperm.xlu0 %9535, %v10537_v46   ;;  %v10548_v43 = vsel %vm4048_vm10, %v3977_v45, -1e+32  ;;  %v10573_v45 = vld [vmem:[#allocation2 + $0x4] sm:$0x1] }
 0x1be   : > { %v4087_v62 = vsel %vm4065_vm2, %v10548_v43, -inf  ;;  %11204 = vst [vmem:[#allocation42_spill] sm:$0xff] %v10573_v45 }
 0x1c1   : > { %4292 = vperm.xlu0 %9535, %v8489_v27   ;;  %v8491_v27 = vadd.s32 4294967295, %v9587_v18  ;;  %v9589_v18 = vld [vmem:[%s9857_s10 + $0x4] sm:$0x1] }
 0x1c2   : > { %v8493_v1 = vadd.s32 4294967295, %v9589_v18 }
 0x1c5   : > { %4299 = vperm.xlu0 %9535, %v8490_v50  }
 0x1c7   : > { %4088 = vmax.xlane.f32.xlu1 %v4087_v62  ;;  %v9588_v62 = vld [vmem:[%s9857_s10 + $0x3] sm:$0x1] }
 0x1d0   : > { %v4074_v2 = vpop.xlane.xlu1 %4073 }
 0x1d1   : > { %v10555_v55 = vmax.f32 %v10552_v59, %v4074_v2  ;;  %v8492_v2 = vadd.s32 4294967295, %v9588_v62 }
 0x1d3   : > { %4277 = vst.msk [vmem:[#allocation2 + $0x2] sm:$0x1] %vm251_vm3, %v10555_v55 }
 0x1d8   : > { %4142 = vperm.xlu1 %9536, %v10555_v55  }
 0x1e8   : > { %v4077_v54 = vpop.xlane.xlu1 %4076 }
 0x1e9   : > { %v10565_v26 = vmax.f32 %v10562_v21, %v4077_v54 }
 0x1eb   : > { %4278 = vst.msk [vmem:[#allocation2 + $0x3] sm:$0x1] %vm251_vm3, %v10565_v26  ;;  %4151 = vperm.xlu0 %9535, %v10565_v26  }
 0x1ef   : > { %4306 = vperm.xlu0 %9535, %v8491_v27   ;;  %v9590_v27 = vld [vmem:[%s9857_s10 + $0x5] sm:$0x1] }
 0x1f0   : > { %v8494_v7 = vadd.s32 4294967295, %v9590_v27 }
 0x200   : > { %v4080_v39 = vpop.xlane.xlu1 %4079 }
 0x201   : > { %v10576_v50 = vmax.f32 %v10573_v45, %v4080_v39  ;;  %v10587_v39 = vld [vmem:[#allocation2 + $0x5] sm:$0x1] }
 0x203   : > { %11205 = vst [vmem:[#allocation43_spill] sm:$0xff] %v10576_v50  ;;  %4279 = vst.msk [vmem:[#allocation2 + $0x4] sm:$0x1] %vm251_vm3, %v10576_v50  ;;  %4160 = vperm.xlu0 %9535, %v10576_v50  }
 0x207   : > { %4313 = vperm.xlu0 %9535, %v8492_v2  }
 0x20b   : > { %4320 = vperm.xlu0 %9535, %v8493_v1  }
 0x20f   : > { %4327 = vperm.xlu0 %9535, %v8494_v7   ;;  %v10599_v7 = vld [vmem:[#allocation2 + $0x6] sm:$0x1] }
 0x210   : > { %11206 = vst [vmem:[#allocation44_spill] sm:$0xff] %v10599_v7 }
 0x213   : > { %4334 = vperm.xlu0 %9535, %v8495_v19  }
 0x218   : > { %v4083_v62 = vpop.xlane.xlu1 %4082 }
 0x219   : > { %v10590_v54 = vmax.f32 %v10587_v39, %v4083_v62 }
 0x21b   : > { %4280 = vst.msk [vmem:[#allocation2 + $0x5] sm:$0x1] %vm251_vm3, %v10590_v54  ;;  %4169 = vperm.xlu1 %9536, %v10590_v54  }
 0x21e   : > { %v4125_v2 = vpop.permute.xlu1 %4124 }
 0x21f   : > { %v4130_v1 = vrot.slane %v4125_v2, %v10450_v23 }
 0x221   : > { %v4194_v30 = vsub.f32 %v10456_v15, %v4130_v1 }
 0x223   : > { %v4202_v19 = vmul.f32 1.442695, %v4194_v30 }
 0x225   : > { %9537 = vpow2.f32 %v4202_v19 }
 0x230   : > { %v4086_v18 = vpop.xlane.xlu0 %4085 }
 0x231   : > { %v10602_v27 = vmax.f32 %v10599_v7, %v4086_v18 }
 0x232   : > { %v9538_v62 = vpop.eup %9537 }
 0x233   : > { %11207 = vst [vmem:[#allocation45_spill] sm:$0xff] %v10602_v27  ;;  %4281 = vst.msk [vmem:[#allocation2 + $0x6] sm:$0x1] %vm251_vm3, %v10602_v27  ;;  %4178 = vperm.xlu1 %9536, %v10602_v27   ;;  %v4234_v2 = vsel %vm4065_vm2, %v9538_v62, 0.0  ;;  %v4371_v45 = vrot.slane %v9538_v62, 7 }
 0x234   : > { %4235 = vadd.xlane.f32.xlu0 %v4234_v2 }
 0x238   : > { %v4134_v15 = vpop.permute.xlu0 %4133 }
 0x239   : > { %v4139_v1 = vrot.slane %v4134_v15, %v10450_v23 }
 0x23b   : > { %v4195_v30 = vsub.f32 %v10490_v33, %v4139_v1 }
 0x23c   : > { %v4293_v19 = vpop.permute.xlu0 %4292 }
 0x23d   : > { %v4204_v18 = vmul.f32 1.442695, %v4195_v30  ;;  %v4297_v50 = vrot.slane %v4293_v19, %v10450_v23 }
 0x23f   : > { %9539 = vpow2.f32 %v4204_v18  ;;  %vm4347_vm12 = vcmp.eq.s32.totalorder %v10453_v40, %v4297_v50 }
 0x240   : > { %v4355_v27 = vsel %vm4347_vm12, 1.0, %v11200_v0  ;;  %v4300_v15 = vpop.permute.xlu0 %4299 }
 0x241   : > { %v4388_v7 = vsel %vm4387_vm13, %v4355_v27, %v4371_v45  ;;  %v4304_v1 = vrot.slane %v4300_v15, %v10450_v23 }
 0x242   : > { %v4398_v2 = vsel %vm4396_vm11, %v4388_v7, 0 }
 0x243   : > { %v4467_v46 = vand.u32 4294901760, %v4398_v2  ;;  %vm4348_vm14 = vcmp.eq.s32.totalorder %v10453_v40, %v4304_v1 }
 0x244   : > { %v4356_v30 = vsel %vm4348_vm14, 1.0, %v11200_v0 }
 0x245   : > { %9141 = vmatmul.mubr.f32.vlgmr.msra.gmra.mxu1 %v4467_v46  ;;  %v4468_v33 = vsub.f32 %v4398_v2, %v4467_v46 }
 0x246   : > { %9151 = vmatpush3.msra.mxu1 %v9848_v5  ;;  %9154 = vmatprep.mubr.msk.f32.mxu1 %vm9705_vm0, %v11200_v0 }
 0x247   : > { %9152 = vmatprep.subr.mxu1 %v11200_v0  ;;  %v4469_v50 = vand.u32 4294901760, %v4468_v33 }
 0x248   : > { %9153 = vmatpush3.msra.mxu1 %v9850_v6 }
 0x249   : > { %9155 = vmatmul.mubr.f32.vlgmr.msra.gmra.mxu1 %v4469_v50  ;;  %9164 = vmatprep.subr.mxu1 %v11200_v0  ;;  %v4470_v45 = vsub.f32 %v4468_v33, %v4469_v50 }
 0x24a   : > { %9165 = vmatpush3.msra.mxu1 %v9848_v5  ;;  %9168 = vmatprep.mubr.msk.f32.mxu1 %vm9705_vm0, %v11200_v0  ;;  %v10636_v5 = vld [vmem:[#allocation2 + $0x7] sm:$0x1] }
 0x24b   : > { %9166 = vmatprep.subr.mxu1 %v11200_v0  ;;  %v4471_v7 = vand.u32 4294901760, %v4470_v45 }
 0x24c   : > { %v10629_v27 = vpop.eup %9539  ;;  %9167 = vmatpush3.msra.mxu1 %v9850_v6 }
 0x24d   : > { %v4372_v62 = vrot.slane %v10629_v27, 7  ;;  %9134 = vmatmul.mubr.f32.vlgmr.msra.gmra.mxu0 %v4471_v7  ;;  %9169 = vmatmul.mubr.f32.vlgmr.msra.gmra.mxu1 %v4467_v46 }
 0x24e   : > { %9144 = vmatpush3.msra.mxu0 %v9861_v8  ;;  %9178 = vmatprep.subr.mxu1 %v11200_v0 }
 0x24f   : > { %v4389_v19 = vsel %vm4387_vm13, %v4356_v30, %v4372_v62  ;;  %9145 = vmatprep.subr.mxu0 %v11200_v0  ;;  %9147 = vmatprep.mubr.msk.f32.mxu0 %vm9705_vm0, %v11200_v0 }
 0x250   : > { %v4860_v6 = vsel %vm4396_vm11, %v4389_v19, 0  ;;  %9146 = vmatpush3.msra.mxu0 %v9865_v10  ;;  %9179 = vmatpush3.msra.mxu1 %v9949_v38  ;;  %v4089_v18 = vpop.xlane.xlu1 %4088 }
 0x251   : > { %v10646_v8 = vmax.f32 %v10636_v5, %v4089_v18  ;;  %9148 = vmatmul.mubr.f32.vlgmr.msra.gmra.mxu0 %v4468_v33  ;;  %9157 = vmatprep.subr.mxu0 %v11200_v0  ;;  %v4929_v2 = vand.u32 4294901760, %v4860_v6 }
 0x252   : > { %9180 = vmatprep.subr.mxu1 %v11200_v0  ;;  %9158 = vmatpush3.msra.mxu0 %v9870_v12 }
 0x253   : > { %v4105_v15 = vsub.f32 %v10636_v5, %v10646_v8  ;;  %4282 = vst.msk [vmem:[#allocation2 + $0x7] sm:$0x1] %vm251_vm3, %v10646_v8  ;;  %9181 = vmatpush3.msra.mxu1 %v9958_v41  ;;  %9182 = vmatprep.mubr.msk.f32.mxu1 %vm9705_vm0, %v11200_v0  ;;  %v4930_v10 = vsub.f32 %v4860_v6, %v4929_v2  ;;  %v8496_v41 = vadd.s32 4294967295, %v10486_v11 }
 0x254   : > { %9159 = vmatprep.subr.mxu0 %v11200_v0  ;;  %9183 = vmatmul.mubr.f32.vlgmr.msra.gmra.mxu1 %v4929_v2  ;;  %v4143_v38 = vpop.permute.xlu1 %4142 }
 0x255   : > { %9192 = vmatprep.subr.mxu1 %v11200_v0  ;;  %4187 = vperm.xlu1 %9536, %v10646_v8   ;;  %v4148_v12 = vrot.slane %v4143_v38, %v10450_v23  ;;  %v4931_v33 = vand.u32 4294901760, %v4930_v10 }
 0x256   : > { %9160 = vmatpush3.msra.mxu0 %v9873_v14  ;;  %9161 = vmatprep.mubr.msk.f32.mxu0 %vm9705_vm0, %v11200_v0 }
 0x257   : > { %9193 = vmatpush3.msra.mxu1 %v9896_v25  ;;  %v4196_v1 = vsub.f32 %v10496_v35, %v4148_v12  ;;  %9162 = vmatmul.mubr.f32.vlgmr.msra.gmra.mxu0 %v4467_v46  ;;  %v4932_v50 = vsub.f32 %v4930_v10, %v4931_v33 }
 0x258   : > { %9194 = vmatprep.subr.mxu1 %v11200_v0  ;;  %9196 = vmatprep.mubr.msk.f32.mxu1 %vm9705_vm0, %v11200_v0 }
 0x259   : > { %v4206_v45 = vmul.f32 1.442695, %v4196_v1  ;;  %9195 = vmatpush3.msra.mxu1 %v9906_v28  ;;  %9171 = vmatprep.subr.mxu0 %v11200_v0  ;;  %v4933_v14 = vand.u32 4294901760, %v4932_v50 }
 0x25a   : > { %9197 = vmatmul.mubr.f32.vlgmr.msra.gmra.mxu1 %v4931_v33  ;;  %9206 = vmatprep.subr.mxu1 %v11200_v0 }
 0x25b   : > { %9541 = vpow2.f32 %v4206_v45  ;;  %4341 = vperm.xlu1 %9536, %v8496_v41   ;;  %9172 = vmatpush3.msra.mxu0 %v9896_v25 }
 0x25c   : > { %9207 = vmatpush3.msra.mxu1 %v9896_v25  ;;  %9173 = vmatprep.subr.mxu0 %v11200_v0 }
 0x25d   : > { %9208 = vmatprep.subr.mxu1 %v11200_v0  ;;  %9174 = vmatpush3.msra.mxu0 %v9906_v28 }
 0x25e   : > { %9175 = vmatprep.mubr.msk.f32.mxu0 %vm9705_vm0, %v11200_v0  ;;  %9209 = vmatpush3.msra.mxu1 %v9906_v28 }
 0x25f   : > { %9210 = vmatprep.mubr.msk.f32.mxu1 %vm9705_vm0, %v11200_v0  ;;  %9176 = vmatmul.mubr.f32.vlgmr.msra.gmra.mxu0 %v4933_v14 }
 0x260   : > { %9185 = vmatprep.subr.mxu0 %v11200_v0  ;;  %9211 = vmatmul.mubr.f32.vlgmr.msra.gmra.mxu1 %v4929_v2 }
 0x261   : > { %9186 = vmatpush3.msra.mxu0 %v9909_v29  ;;  %9189 = vmatprep.mubr.msk.f32.mxu0 %vm9705_vm0, %v11200_v0 }
 0x262   : > { %9187 = vmatprep.subr.mxu0 %v11200_v0  ;;  %9220 = vmatprep.subr.mxu1 %v11200_v0 }
 0x263   : > { %9188 = vmatpush3.msra.mxu0 %v9928_v34  ;;  %9221 = vmatpush3.msra.mxu1 %v10024_v57 }
 0x264   : > { %9190 = vmatmul.mubr.f32.vlgmr.msra.gmra.mxu0 %v4930_v10  ;;  %9199 = vmatprep.subr.mxu0 %v11200_v0 }
 0x265   : > { %9200 = vmatpush3.msra.mxu0 %v9924_v32  ;;  %9203 = vmatprep.mubr.msk.f32.mxu0 %vm9705_vm0, %v11200_v0 }
 0x266   : > { %9201 = vmatprep.subr.mxu0 %v11200_v0  ;;  %v4152_v25 = vpop.permute.xlu0 %4151  ;;  %9222 = vmatprep.subr.mxu1 %v11200_v0 }
 0x267   : > { %9202 = vmatpush3.msra.mxu0 %v9939_v37  ;;  %v4157_v28 = vrot.slane %v4152_v25, %v10450_v23  ;;  %9223 = vmatpush3.msra.mxu1 %v10033_v60 }
 0x268   : > { %v9542_v29 = vpop.eup %9541  ;;  %9204 = vmatmul.mubr.f32.vlgmr.msra.gmra.mxu0 %v4929_v2  ;;  %9224 = vmatprep.mubr.msk.f32.mxu1 %vm9705_vm0, %v11200_v0 }
 0x269   : > { %v4197_v32 = vsub.f32 %v10502_v42, %v4157_v28  ;;  %v4240_v34 = vsel %vm4065_vm2, %v9542_v29, 0.0  ;;  %9234 = vmatprep.subr.mxu1 %v11200_v0  ;;  %9213 = vmatprep.subr.mxu0 %v11200_v0  ;;  %v4373_v42 = vrot.slane %v9542_v29, 7 }
 0x26a   : > { %v4307_v57 = vpop.permute.xlu0 %4306  ;;  %4241 = vadd.xlane.f32.xlu0 %v4240_v34  ;;  %9214 = vmatpush3.msra.mxu0 %v9970_v44 }
 0x26b   : > { %v4208_v37 = vmul.f32 1.442695, %v4197_v32  ;;  %v4311_v60 = vrot.slane %v4307_v57, %v10450_v23  ;;  %9215 = vmatprep.subr.mxu0 %v11200_v0  ;;  %9217 = vmatprep.mubr.msk.f32.mxu0 %vm9705_vm0, %v11200_v0 }
 0x26c   : > { %9216 = vmatpush3.msra.mxu0 %v9981_v47 }
 0x26d   : > { %9543 = vpow2.f32 %v4208_v37  ;;  %vm4349_vm15 = vcmp.eq.s32.totalorder %v10453_v40, %v4311_v60  ;;  %9227 = vmatprep.subr.mxu0 %v11200_v0  ;;  %v11209_v60 = vld [vmem:[#allocation39_spill] sm:$0xff] }
 0x26e   : > { %v4357_v11 = vsel %vm4349_vm15, 1.0, %v11200_v0 }
 0x26f   : > { %v4390_v35 = vsel %vm4387_vm13, %v4357_v11, %v4373_v42  ;;  %v11210_v42 = vsub.f32 %v10518_v16, %v11209_v60  ;;  %v11211_v11 = vld [vmem:[#allocation13_spill] sm:$0xff]  ;;  %v11229_v60 = vsub.f32 %v10587_v39, %v10590_v54 }
 0x270   : > { %v5322_v46 = vsel %vm4396_vm11, %v4390_v35, 0 }
 0x271   : > { %v5391_v7 = vand.u32 4294901760, %v5322_v46 }
 0x273   : > { %9225 = vmatmul.mubr.f32.vlgmr.msra.gmra.mxu1 %v5391_v7  ;;  %v5392_v62 = vsub.f32 %v5322_v46, %v5391_v7  ;;  %v11212_v46 = vld [vmem:[#allocation12_spill] sm:$0xff] }
 0x274   : > { %9235 = vmatpush3.msra.mxu1 %v9970_v44  ;;  %9238 = vmatprep.mubr.msk.f32.mxu1 %vm9705_vm0, %v11200_v0 }
 0x275   : > { %9236 = vmatprep.subr.mxu1 %v11200_v0  ;;  %v5393_v30 = vand.u32 4294901760, %v5392_v62 }
 0x276   : > { %9237 = vmatpush3.msra.mxu1 %v9981_v47 }
 0x277   : > { %9239 = vmatmul.mubr.f32.vlgmr.msra.gmra.mxu1 %v5393_v30  ;;  %9248 = vmatprep.subr.mxu1 %v11200_v0  ;;  %v5394_v19 = vsub.f32 %v5392_v62, %v5393_v30 }
 0x278   : > { %9249 = vmatpush3.msra.mxu1 %v9970_v44  ;;  %9252 = vmatprep.mubr.msk.f32.mxu1 %vm9705_vm0, %v11200_v0  ;;  %v4237_v44 = vsel %vm4065_vm2, %v10629_v27, 0.0 }
 0x279   : > { %9250 = vmatprep.subr.mxu1 %v11200_v0  ;;  %v5395_v6 = vand.u32 4294901760, %v5394_v19  ;;  %v11214_v19 = vld [vmem:[#allocation14_spill] sm:$0xff] }
 0x27a   : > { %v9544_v18 = vpop.eup %9543  ;;  %9251 = vmatpush3.msra.mxu1 %v9981_v47 }
 0x27b   : > { %9218 = vmatmul.mubr.f32.vlgmr.msra.gmra.mxu0 %v5395_v6  ;;  %9253 = vmatmul.mubr.f32.vlgmr.msra.gmra.mxu1 %v5391_v7  ;;  %v4243_v2 = vsel %vm4065_vm2, %v9544_v18, 0.0 }
 0x27c   : > { %9228 = vmatpush3.msra.mxu0 %v9984_v48  ;;  %4244 = vadd.xlane.f32.xlu0 %v4243_v2  ;;  %v11215_v2 = vld [vmem:[#allocation22_spill] sm:$0xff] }
 0x27d   : > { %9229 = vmatprep.subr.mxu0 %v11200_v0  ;;  %9231 = vmatprep.mubr.msk.f32.mxu0 %vm9705_vm0, %v11200_v0 }
 0x27e   : > { %v4161_v10 = vpop.permute.xlu0 %4160  ;;  %9230 = vmatpush3.msra.mxu0 %v10003_v53  ;;  %9262 = vmatprep.subr.mxu1 %v11200_v0 }
 0x27f   : > { %4238 = vadd.xlane.f32.xlu1 %v4237_v44  ;;  %v4166_v47 = vrot.slane %v4161_v10, %v10450_v23  ;;  %9232 = vmatmul.mubr.f32.vlgmr.msra.gmra.mxu0 %v5392_v62 }
 0x280   : > { %9241 = vmatprep.subr.mxu0 %v11200_v0  ;;  %9245 = vmatprep.mubr.msk.f32.mxu0 %vm9705_vm0, %v11200_v0 }
 0x281   : > { %v4198_v48 = vsub.f32 %v10508_v61, %v4166_v47  ;;  %9242 = vmatpush3.msra.mxu0 %v9999_v51  ;;  %9263 = vmatpush3.msra.mxu1 %v10099_v20  ;;  %v4374_v51 = vrot.slane %v9544_v18, 7 }
 0x282   : > { %9243 = vmatprep.subr.mxu0 %v11200_v0  ;;  %v4314_v53 = vpop.permute.xlu0 %4313  ;;  %9264 = vmatprep.subr.mxu1 %v11200_v0 }
 0x283   : > { %v4210_v27 = vmul.f32 1.442695, %v4198_v48  ;;  %v4318_v38 = vrot.slane %v4314_v53, %v10450_v23  ;;  %9244 = vmatpush3.msra.mxu0 %v10014_v56  ;;  %9265 = vmatpush3.msra.mxu1 %v10108_v24  ;;  %v11216_v48 = vld [vmem:[#allocation15_spill] sm:$0xff]  ;;  %v11217_v53 = vld [vmem:[#allocation40_spill] sm:$0xff] }
 0x284   : > { %9246 = vmatmul.mubr.f32.vlgmr.msra.gmra.mxu0 %v5391_v7  ;;  %9266 = vmatprep.mubr.msk.f32.mxu1 %vm9705_vm0, %v11200_v0  ;;  %v11213_v7 = vld [vmem:[#allocation21_spill] sm:$0xff] }
 0x285   : > { %9545 = vpow2.f32 %v4210_v27  ;;  %vm4350_vm1 = vcmp.eq.s32.totalorder %v10453_v40, %v4318_v38  ;;  %9276 = vmatprep.subr.mxu1 %v11200_v0  ;;  %9255 = vmatprep.subr.mxu0 %v11200_v0 }
 0x286   : > { %v4358_v20 = vsel %vm4350_vm1, 1.0, %v11200_v0  ;;  %9256 = vmatpush3.msra.mxu0 %v10045_v63  ;;  %9259 = vmatprep.mubr.msk.f32.mxu0 %vm9705_vm0, %v11200_v0  ;;  %v4321_v12 = vpop.permute.xlu0 %4320 }
 0x287   : > { %v4391_v56 = vsel %vm4387_vm13, %v4358_v20, %v4374_v51  ;;  %9257 = vmatprep.subr.mxu0 %v11200_v0  ;;  %v4325_v41 = vrot.slane %v4321_v12, %v10450_v23 }
 0x288   : > { %v5784_v24 = vsel %vm4396_vm11, %v4391_v56, 0  ;;  %9258 = vmatpush3.msra.mxu0 %v10056_v3  ;;  %v11218_v56 = vld [vmem:[#allocation16_spill] sm:$0xff] }
 0x289   : > { %v5853_v61 = vand.u32 4294901760, %v5784_v24  ;;  %9269 = vmatprep.subr.mxu0 %v11200_v0  ;;  %vm4351_vm4 = vcmp.eq.s32.totalorder %v10453_v40, %v4325_v41  ;;  %v4218_v41 = vld [vmem:[#allocation3] sm:$0x1] }
 0x28a   : > { %v4359_v29 = vsel %vm4351_vm4, 1.0, %v11200_v0 }
 0x28b   : > { %9267 = vmatmul.mubr.f32.vlgmr.msra.gmra.mxu1 %v5853_v61  ;;  %v5854_v33 = vsub.f32 %v5784_v24, %v5853_v61 }
 0x28c   : > { %9277 = vmatpush3.msra.mxu1 %v10045_v63  ;;  %9280 = vmatprep.mubr.msk.f32.mxu1 %vm9705_vm0, %v11200_v0 }
 0x28d   : > { %9278 = vmatprep.subr.mxu1 %v11200_v0  ;;  %v5855_v1 = vand.u32 4294901760, %v5854_v33 }
 0x28e   : > { %9279 = vmatpush3.msra.mxu1 %v10056_v3 }
 0x28f   : > { %9281 = vmatmul.mubr.f32.vlgmr.msra.gmra.mxu1 %v5855_v1  ;;  %9290 = vmatprep.subr.mxu1 %v11200_v0  ;;  %v5856_v50 = vsub.f32 %v5854_v33, %v5855_v1  ;;  %v11219_v1 = vld [vmem:[#allocation17_spill] sm:$0xff] }
 0x290   : > { %9291 = vmatpush3.msra.mxu1 %v10045_v63  ;;  %9294 = vmatprep.mubr.msk.f32.mxu1 %vm9705_vm0, %v11200_v0 }
 0x291   : > { %9292 = vmatprep.subr.mxu1 %v11200_v0  ;;  %v5857_v45 = vand.u32 4294901760, %v5856_v50  ;;  %v11220_v50 = vld [vmem:[#allocation19_spill] sm:$0xff] }
 0x292   : > { %v9546_v14 = vpop.eup %9545  ;;  %9293 = vmatpush3.msra.mxu1 %v10056_v3 }
 0x293   : > { %v4375_v25 = vrot.slane %v9546_v14, 7  ;;  %9260 = vmatmul.mubr.f32.vlgmr.msra.gmra.mxu0 %v5857_v45  ;;  %9295 = vmatmul.mubr.f32.vlgmr.msra.gmra.mxu1 %v5853_v61  ;;  %v4246_v28 = vsel %vm4065_vm2, %v9546_v14, 0.0  ;;  %v11221_v14 = vld [vmem:[#allocation29_spill] sm:$0xff] }
 0x294   : > { %4247 = vadd.xlane.f32.xlu1 %v4246_v28  ;;  %9270 = vmatpush3.msra.mxu0 %v10059_v4 }
 0x295   : > { %v4392_v63 = vsel %vm4387_vm13, %v4359_v29, %v4375_v25  ;;  %9271 = vmatprep.subr.mxu0 %v11200_v0  ;;  %9304 = vmatprep.subr.mxu1 %v11200_v0 }
 0x296   : > { %v6246_v32 = vsel %vm4396_vm11, %v4392_v63, 0  ;;  %9272 = vmatpush3.msra.mxu0 %v10077_v13  ;;  %9273 = vmatprep.mubr.msk.f32.mxu0 %vm9705_vm0, %v11200_v0  ;;  %v4170_v3 = vpop.permute.xlu1 %4169  ;;  %v11222_v63 = vld [vmem:[#allocation18_spill] sm:$0xff] }
 0x297   : > { %9305 = vmatpush3.msra.mxu1 %v10177_v52  ;;  %v4175_v34 = vrot.slane %v4170_v3, %v10450_v23  ;;  %9274 = vmatmul.mubr.f32.vlgmr.msra.gmra.mxu0 %v5854_v33  ;;  %v6315_v4 = vand.u32 4294901760, %v6246_v32  ;;  %v11224_v3 = vld [vmem:[#allocation30_spill] sm:$0xff] }
 0x298   : > { %9283 = vmatprep.subr.mxu0 %v11200_v0  ;;  %9306 = vmatprep.subr.mxu1 %v11200_v0 }
 0x299   : > { %v4199_v57 = vsub.f32 %v10514_v49, %v4175_v34  ;;  %9284 = vmatpush3.msra.mxu0 %v10073_v9  ;;  %9307 = vmatpush3.msra.mxu1 %v10186_v58  ;;  %v6316_v13 = vsub.f32 %v6246_v32, %v6315_v4  ;;  %v4328_v58 = vpop.permute.xlu0 %4327  ;;  %v11223_v32 = vld [vmem:[#allocation20_spill] sm:$0xff]  ;;  %v11225_v34 = vsub.f32 %v10552_v59, %v10555_v55 }
 0x29a   : > { %9308 = vmatprep.mubr.msk.f32.mxu1 %vm9705_vm0, %v11200_v0  ;;  %9285 = vmatprep.subr.mxu0 %v11200_v0  ;;  %v4332_v49 = vrot.slane %v4328_v58, %v10450_v23  ;;  %v11227_v55 = vsub.f32 %v10562_v21, %v10565_v26  ;;  %v11228_v58 = vld [vmem:[#allocation25_spill] sm:$0xff]  ;;  %v4120_v26 = vmul.f32 1.442695, %v4105_v15  ;;  %v11230_v15 = vld [vmem:[#allocation24_spill] sm:$0xff] }
 0x29b   : > { %v4212_v52 = vmul.f32 1.442695, %v4199_v57  ;;  %9309 = vmatmul.mubr.f32.vlgmr.msra.gmra.mxu1 %v6315_v4  ;;  %9318 = vmatprep.subr.mxu1 %v11200_v0  ;;  %v6317_v37 = vand.u32 4294901760, %v6316_v13 }
 0x29c   : > { %9286 = vmatpush3.msra.mxu0 %v10088_v17  ;;  %9287 = vmatprep.mubr.msk.f32.mxu0 %vm9705_vm0, %v11200_v0  ;;  %vm4352_vm5 = vcmp.eq.s32.totalorder %v10453_v40, %v4332_v49 }
 0x29d   : > { %9547 = vpow2.f32 %v4212_v52  ;;  %9319 = vmatpush3.msra.mxu1 %v10124_v31  ;;  %9288 = vmatmul.mubr.f32.vlgmr.msra.gmra.mxu0 %v5853_v61  ;;  %v6318_v9 = vsub.f32 %v6316_v13, %v6317_v37  ;;  %v4360_v30 = vsel %vm4352_vm5, 1.0, %v11200_v0  ;;  %v4335_v33 = vpop.permute.xlu0 %4334 }
 0x29e   : > { %9320 = vmatprep.subr.mxu1 %v11200_v0  ;;  %9322 = vmatprep.mubr.msk.f32.mxu1 %vm9705_vm0, %v11200_v0  ;;  %v4339_v25 = vrot.slane %v4335_v33, %v10450_v23 }
 0x29f   : > { %9321 = vmatpush3.msra.mxu1 %v10135_v36  ;;  %9297 = vmatprep.subr.mxu0 %v11200_v0  ;;  %v6319_v17 = vand.u32 4294901760, %v6318_v9  ;;  %v4112_v9 = vmul.f32 1.442695, %v11227_v55  ;;  %v4220_v55 = vld [vmem:[#allocation3 + $0x2] sm:$0x1] }
 0x2a0   : > { %9323 = vmatmul.mubr.f32.vlgmr.msra.gmra.mxu1 %v6317_v37  ;;  %9332 = vmatprep.subr.mxu1 %v11200_v0  ;;  %vm4353_vm6 = vcmp.eq.s32.totalorder %v10453_v40, %v4339_v25  ;;  %v11226_v37 = vld [vmem:[#allocation23_spill] sm:$0xff] }
 0x2a1   : > { %9298 = vmatpush3.msra.mxu0 %v10124_v31  ;;  %9333 = vmatpush3.msra.mxu1 %v10124_v31  ;;  %v11208_v31 = vld [vmem:[#allocation11_spill] sm:$0xff]  ;;  %v4361_v59 = vsel %vm4353_vm6, 1.0, %v11200_v0 }
 0x2a2   : > { %9299 = vmatprep.subr.mxu0 %v11200_v0  ;;  %9334 = vmatprep.subr.mxu1 %v11200_v0 }
 0x2a3   : > { %9300 = vmatpush3.msra.mxu0 %v10135_v36  ;;  %9301 = vmatprep.mubr.msk.f32.mxu0 %vm9705_vm0, %v11200_v0 }
 0x2a4   : > { %9335 = vmatpush3.msra.mxu1 %v10135_v36  ;;  %9336 = vmatprep.mubr.msk.f32.mxu1 %vm9705_vm0, %v11200_v0  ;;  %v4106_v36 = vmul.f32 1.442695, %v11210_v42  ;;  %v4116_v42 = vmul.f32 1.442695, %v11229_v60  ;;  %v11246_v60 = vld [vmem:[#allocation32_spill] sm:$0xff] }
 0x2a5   : > { %9302 = vmatmul.mubr.f32.vlgmr.msra.gmra.mxu0 %v6319_v17  ;;  %9311 = vmatprep.subr.mxu0 %v11200_v0 }
 0x2a6   : > { %9337 = vmatmul.mubr.f32.vlgmr.msra.gmra.mxu1 %v6315_v4  ;;  %9312 = vmatpush3.msra.mxu0 %v11208_v31  ;;  %9549 = vpow2.f32 %v4106_v36 }
 0x2a7   : > { %9313 = vmatprep.subr.mxu0 %v11200_v0  ;;  %9315 = vmatprep.mubr.msk.f32.mxu0 %vm9705_vm0, %v11200_v0 }
 0x2a8   : > { %9314 = vmatpush3.msra.mxu0 %v11211_v11  ;;  %9346 = vmatprep.subr.mxu1 %v11200_v0 }
 0x2a9   : > { %9316 = vmatmul.mubr.f32.vlgmr.msra.gmra.mxu0 %v6316_v13  ;;  %9325 = vmatprep.subr.mxu0 %v11200_v0 }
 0x2aa   : > { %v9548_v35 = vpop.eup %9547  ;;  %9326 = vmatpush3.msra.mxu0 %v11212_v46  ;;  %9329 = vmatprep.mubr.msk.f32.mxu0 %vm9705_vm0, %v11200_v0 }
 0x2ab   : > { %9327 = vmatprep.subr.mxu0 %v11200_v0  ;;  %v4249_v16 = vsel %vm4065_vm2, %v9548_v35, 0.0  ;;  %9347 = vmatpush3.msra.mxu1 %v11213_v7  ;;  %v4376_v62 = vrot.slane %v9548_v35, 7  ;;  %v11232_v7 = vld [vmem:[#allocation37_spill] sm:$0xff] }
 0x2ac   : > { %9328 = vmatpush3.msra.mxu0 %v11214_v19  ;;  %4250 = vadd.xlane.f32.xlu0 %v4249_v16  ;;  %v11231_v16 = vld [vmem:[#allocation27_spill] sm:$0xff] }
 0x2ad   : > { %9330 = vmatmul.mubr.f32.vlgmr.msra.gmra.mxu0 %v6315_v4  ;;  %9348 = vmatprep.subr.mxu1 %v11200_v0  ;;  %v4393_v6 = vsel %vm4387_vm13, %v4360_v30, %v4376_v62  ;;  %v4110_v4 = vmul.f32 1.442695, %v11225_v34  ;;  %v11243_v34 = vld [vmem:[#allocation44_spill] sm:$0xff] }
 0x2ae   : > { %v4179_v18 = vpop.permute.xlu1 %4178  ;;  %9349 = vmatpush3.msra.mxu1 %v11215_v2  ;;  %9350 = vmatprep.mubr.msk.f32.mxu1 %vm9705_vm0, %v11200_v0  ;;  %v6708_v44 = vsel %vm4396_vm11, %v4393_v6, 0 }
 0x2af   : > { %v4184_v10 = vrot.slane %v4179_v18, %v10450_v23  ;;  %v6777_v47 = vand.u32 4294901760, %v6708_v44  ;;  %9360 = vmatprep.subr.mxu1 %v11200_v0  ;;  %9339 = vmatprep.subr.mxu0 %v11200_v0  ;;  %v11234_v18 = vld [vmem:[#allocation28_spill] sm:$0xff] }
 0x2b0   : > { %9340 = vmatpush3.msra.mxu0 %v11216_v48  ;;  %9343 = vmatprep.mubr.msk.f32.mxu0 %vm9705_vm0, %v11200_v0 }
 0x2b1   : > { %v4200_v27 = vsub.f32 %v11217_v53, %v4184_v10  ;;  %v6778_v38 = vsub.f32 %v6708_v44, %v6777_v47  ;;  %9351 = vmatmul.mubr.f32.vlgmr.msra.gmra.mxu1 %v6777_v47  ;;  %9341 = vmatprep.subr.mxu0 %v11200_v0  ;;  %v11235_v10 = vld [vmem:[#allocation38_spill] sm:$0xff]  ;;  %v11236_v53 = vld [vmem:[#allocation31_spill] sm:$0xff] }
 0x2b2   : > { %9361 = vmatpush3.msra.mxu1 %v11216_v48  ;;  %9364 = vmatprep.mubr.msk.f32.mxu1 %vm9705_vm0, %v11200_v0 }
 0x2b3   : > { %v4214_v51 = vmul.f32 1.442695, %v4200_v27  ;;  %9362 = vmatprep.subr.mxu1 %v11200_v0  ;;  %v6779_v20 = vand.u32 4294901760, %v6778_v38  ;;  %9342 = vmatpush3.msra.mxu0 %v11218_v56  ;;  %v10866_v12 = vpop.eup %9549 }
 0x2b4   : > { %9363 = vmatpush3.msra.mxu1 %v11218_v56  ;;  %9353 = vmatprep.subr.mxu0 %v11200_v0  ;;  %v4226_v45 = vmul.f32 %v10866_v12, %v4218_v41  ;;  %v8104_v5 = vrot.slane %v10866_v12, %v10450_v23  ;;  %v11238_v12 = vld [vmem:[#allocation41_spill] sm:$0xff] }
 0x2b5   : > { %9551 = vpow2.f32 %v4214_v51  ;;  %9365 = vmatmul.mubr.f32.vlgmr.msra.gmra.mxu1 %v6779_v20  ;;  %9374 = vmatprep.subr.mxu1 %v11200_v0  ;;  %v6780_v24 = vsub.f32 %v6778_v38, %v6779_v20  ;;  %v11237_v20 = vld [vmem:[#allocation33_spill] sm:$0xff]  ;;  %v11239_v33 = vsub.f32 %v10534_v22, %v11238_v12 }
 0x2b6   : > { %9375 = vmatpush3.msra.mxu1 %v11216_v48  ;;  %9378 = vmatprep.mubr.msk.f32.mxu1 %vm9705_vm0, %v11200_v0  ;;  %9553 = vpow2.f32 %v4110_v4  ;;  %v8141_v30 = vsel %vm4387_vm13, 1.0, %v8104_v5  ;;  %v11244_v4 = vld [vmem:[#allocation45_spill] sm:$0xff] }
 0x2b7   : > { %9376 = vmatprep.subr.mxu1 %v11200_v0  ;;  %v6781_v61 = vand.u32 4294901760, %v6780_v24  ;;  %9555 = vpow2.f32 %v4112_v9  ;;  %v4108_v41 = vmul.f32 1.442695, %v11239_v33 }
 0x2b8   : > { %9377 = vmatpush3.msra.mxu1 %v11218_v56  ;;  %9557 = vpow2.f32 %v4116_v42 }
 0x2b9   : > { %9344 = vmatmul.mubr.f32.vlgmr.msra.gmra.mxu0 %v6781_v61  ;;  %9379 = vmatmul.mubr.f32.vlgmr.msra.gmra.mxu1 %v6777_v47  ;;  %9559 = vpow2.f32 %v4120_v26 }
 0x2ba   : > { %9354 = vmatpush3.msra.mxu0 %v11219_v1  ;;  %9357 = vmatprep.mubr.msk.f32.mxu0 %vm9705_vm0, %v11200_v0 }
 0x2bb   : > { %9355 = vmatprep.subr.mxu0 %v11200_v0  ;;  %9388 = vmatprep.subr.mxu1 %v11200_v0 }
 0x2bc   : > { %9356 = vmatpush3.msra.mxu0 %v11220_v50  ;;  %9389 = vmatpush3.msra.mxu1 %v11221_v14 }
 0x2bd   : > { %v4236_v28 = vpop.xlane.xlu0 %4235  ;;  %9358 = vmatmul.mubr.f32.vlgmr.msra.gmra.mxu0 %v6778_v38  ;;  %9367 = vmatprep.subr.mxu0 %v11200_v0 }
 0x2be   : > { %v4258_v29 = vadd.f32 %v4236_v28, %v4226_v45  ;;  %9368 = vmatpush3.msra.mxu0 %v11222_v63  ;;  %9371 = vmatprep.mubr.msk.f32.mxu0 %vm9705_vm0, %v11200_v0  ;;  %v11240_v28 = vld [vmem:[#allocation42_spill] sm:$0xff] }
 0x2bf   : > { %9369 = vmatprep.subr.mxu0 %v11200_v0  ;;  %9390 = vmatprep.subr.mxu1 %v11200_v0 }
 0x2c0   : > { %4267 = vst.msk [vmem:[#allocation3] sm:$0x1] %vm251_vm3, %v4258_v29  ;;  %9370 = vmatpush3.msra.mxu0 %v11223_v32  ;;  %9391 = vmatpush3.msra.mxu1 %v11224_v3  ;;  %v11241_v29 = vld [vmem:[#allocation43_spill] sm:$0xff] }
 0x2c1   : > { %9372 = vmatmul.mubr.f32.vlgmr.msra.gmra.mxu0 %v6777_v47  ;;  %9392 = vmatprep.mubr.msk.f32.mxu1 %vm9705_vm0, %v11200_v0  ;;  %v11242_v63 = vsub.f32 %v11240_v28, %v11241_v29 }
 0x2c2   : > { %v9552_v57 = vpop.eup %9551  ;;  %9402 = vmatprep.subr.mxu1 %v11200_v0  ;;  %9381 = vmatprep.subr.mxu0 %v11200_v0 }
 0x2c3   : > { %v4252_v13 = vsel %vm4065_vm2, %v9552_v57, 0.0  ;;  %v4377_v52 = vrot.slane %v9552_v57, 7  ;;  %9382 = vmatpush3.msra.mxu0 %v11226_v37  ;;  %9385 = vmatprep.mubr.msk.f32.mxu0 %vm9705_vm0, %v11200_v0  ;;  %v10927_v8 = vpop.eup %9553  ;;  %v4114_v32 = vmul.f32 1.442695, %v11242_v63  ;;  %v11245_v57 = vsub.f32 %v11243_v34, %v11244_v4  ;;  %v4222_v34 = vld [vmem:[#allocation3 + $0x4] sm:$0x1] }
 0x2c4   : > { %4253 = vadd.xlane.f32.xlu1 %v4252_v13  ;;  %9383 = vmatprep.subr.mxu0 %v11200_v0  ;;  %v8112_v19 = vrot.slane %v10927_v8, %v10450_v23  ;;  %v10941_v6 = vpop.eup %9555 }
 0x2c5   : > { %v4394_v17 = vsel %vm4387_vm13, %v4361_v59, %v4377_v52  ;;  %9384 = vmatpush3.msra.mxu0 %v11228_v58  ;;  %v8116_v44 = vrot.slane %v10941_v6, %v10450_v23  ;;  %v10953_v47 = vpop.eup %9557  ;;  %v4118_v13 = vmul.f32 1.442695, %v11245_v57 }
 0x2c6   : > { %v7170_v49 = vsel %vm4396_vm11, %v4394_v17, 0  ;;  %9395 = vmatprep.subr.mxu0 %v11200_v0  ;;  %v8143_v2 = vsel %vm4387_vm13, 1.0, %v8112_v19  ;;  %v8124_v38 = vrot.slane %v10953_v47, %v10450_v23  ;;  %v10966_v51 = vpop.eup %9559 }
 0x2c7   : > { %v7239_v31 = vand.u32 4294901760, %v7170_v49  ;;  %v8144_v27 = vsel %vm4387_vm13, 1.0, %v8116_v44  ;;  %v8132_v61 = vrot.slane %v10966_v51, %v10450_v23  ;;  %v8224_v9 = vld [vmem:[#allocation3] sm:$0x1] }
 0x2c8   : > { %v8146_v24 = vsel %vm4387_vm13, 1.0, %v8124_v38 }
 0x2c9   : > { %v7240_v36 = vsub.f32 %v7170_v49, %v7239_v31  ;;  %9393 = vmatmul.mubr.f32.vlgmr.msra.gmra.mxu1 %v7239_v31  ;;  %v8148_v14 = vsel %vm4387_vm13, 1.0, %v8132_v61 }
 0x2ca   : > { %9403 = vmatpush3.msra.mxu1 %v11226_v37  ;;  %9406 = vmatprep.mubr.msk.f32.mxu1 %vm9705_vm0, %v11200_v0 }
 0x2cb   : > { %9404 = vmatprep.subr.mxu1 %v11200_v0  ;;  %v7241_v21 = vand.u32 4294901760, %v7240_v36 }
 0x2cc   : > { %9405 = vmatpush3.msra.mxu1 %v11228_v58 }
 0x2cd   : > { %9407 = vmatmul.mubr.f32.vlgmr.msra.gmra.mxu1 %v7241_v21  ;;  %9416 = vmatprep.subr.mxu1 %v11200_v0  ;;  %v7242_v54 = vsub.f32 %v7240_v36, %v7241_v21 }
 0x2ce   : > { %9417 = vmatpush3.msra.mxu1 %v11226_v37  ;;  %9420 = vmatprep.mubr.msk.f32.mxu1 %vm9705_vm0, %v11200_v0 }
 0x2cf   : > { %9418 = vmatprep.subr.mxu1 %v11200_v0  ;;  %v7243_v39 = vand.u32 4294901760, %v7242_v54  ;;  %v11248_v54 = vld [vmem:[#allocation34_spill] sm:$0xff] }
 0x2d0   : > { %v4188_v11 = vpop.permute.xlu1 %4187  ;;  %9419 = vmatpush3.msra.mxu1 %v11228_v58  ;;  %v4228_v58 = vmul.f32 %v10927_v8, %v4220_v55 }
 0x2d1   : > { %v4193_v35 = vrot.slane %v4188_v11, %v10450_v23  ;;  %9386 = vmatmul.mubr.f32.vlgmr.msra.gmra.mxu0 %v7243_v39  ;;  %9421 = vmatmul.mubr.f32.vlgmr.msra.gmra.mxu1 %v7239_v31  ;;  %v11249_v39 = vld [vmem:[#allocation36_spill] sm:$0xff] }
 0x2d2   : > { %9396 = vmatpush3.msra.mxu0 %v11230_v15  ;;  %9399 = vmatprep.mubr.msk.f32.mxu0 %vm9705_vm0, %v11200_v0 }
 0x2d3   : > { %v4201_v46 = vsub.f32 %v10548_v43, %v4193_v35  ;;  %9397 = vmatprep.subr.mxu0 %v11200_v0  ;;  %9430 = vmatprep.subr.mxu1 %v11200_v0  ;;  %v11233_v43 = vld [vmem:[#allocation26_spill] sm:$0xff] }
 0x2d4   : > { %9398 = vmatpush3.msra.mxu0 %v11231_v16  ;;  %9431 = vmatpush3.msra.mxu1 %v11232_v7 }
 0x2d5   : > { %v4216_v62 = vmul.f32 1.442695, %v4201_v46  ;;  %9400 = vmatmul.mubr.f32.vlgmr.msra.gmra.mxu0 %v7240_v36  ;;  %9409 = vmatprep.subr.mxu0 %v11200_v0  ;;  %v11247_v36 = vld [vmem:[#allocation35_spill] sm:$0xff] }
 0x2d6   : > { %8159 = vperm.xlu1 %9536, %v8141_v30   ;;  %9410 = vmatpush3.msra.mxu0 %v11233_v43  ;;  %v4342_v48 = vpop.permute.xlu1 %4341  ;;  %v4219_v30 = vld [vmem:[#allocation3 + $0x1] sm:$0x1] }
 0x2d7   : > { %9561 = vpow2.f32 %v4216_v62  ;;  %9411 = vmatprep.subr.mxu0 %v11200_v0  ;;  %9413 = vmatprep.mubr.msk.f32.mxu0 %vm9705_vm0, %v11200_v0  ;;  %v4346_v56 = vrot.slane %v4342_v48, %v10450_v23 }
 0x2d8   : > { %9412 = vmatpush3.msra.mxu0 %v11234_v18  ;;  %9432 = vmatprep.subr.mxu1 %v11200_v0  ;;  %9563 = vpow2.f32 %v4108_v41 }
 0x2d9   : > { %9414 = vmatmul.mubr.f32.vlgmr.msra.gmra.mxu0 %v7239_v31  ;;  %9433 = vmatpush3.msra.mxu1 %v11235_v10  ;;  %vm4354_vm7 = vcmp.eq.s32.totalorder %v10453_v40, %v4346_v56  ;;  %9565 = vpow2.f32 %v4114_v32 }
 0x2da   : > { %8169 = vperm.xlu1 %9536, %v8143_v2   ;;  %9434 = vmatprep.mubr.msk.f32.mxu1 %vm9705_vm0, %v11200_v0  ;;  %v4362_v25 = vsel %vm4354_vm7, 1.0, %v11200_v0  ;;  %9567 = vpow2.f32 %v4118_v13 }
 0x2db   : > { %9444 = vmatprep.subr.mxu1 %v11200_v0  ;;  %9423 = vmatprep.subr.mxu0 %v11200_v0  ;;  %9569 = vrcp.f32 %v8224_v9 }
 0x2dc   : > { %9424 = vmatpush3.msra.mxu0 %v11236_v53  ;;  %9427 = vmatprep.mubr.msk.f32.mxu0 %vm9705_vm0, %v11200_v0 }
 0x2dd   : > { %9425 = vmatprep.subr.mxu0 %v11200_v0 }
 0x2de   : > { %8174 = vperm.xlu1 %9536, %v8144_v27   ;;  %9426 = vmatpush3.msra.mxu0 %v11237_v20 }
 0x2df   : > { %9437 = vmatprep.subr.mxu0 %v11200_v0 }
 0x2e2   : > { %8184 = vperm.xlu1 %9536, %v8146_v24  }
 0x2e4   : > { %v9562_v1 = vpop.eup %9561 }
 0x2e5   : > { %v4378_v50 = vrot.slane %v9562_v1, 7  ;;  %v4255_v45 = vsel %vm4065_vm2, %v9562_v1, 0.0  ;;  %v9564_v31 = vpop.eup %9563 }
 0x2e6   : > { %4256 = vadd.xlane.f32.xlu0 %v4255_v45  ;;  %8194 = vperm.xlu1 %9536, %v8148_v14   ;;  %v8108_v21 = vrot.slane %v9564_v31, %v10450_v23  ;;  %v9566_v26 = vpop.eup %9565  ;;  %v4227_v44 = vmul.f32 %v9564_v31, %v4219_v30 }
 0x2e7   : > { %v4395_v22 = vsel %vm4387_vm13, %v4362_v25, %v4378_v50  ;;  %v8120_v35 = vrot.slane %v9566_v26, %v10450_v23  ;;  %v11016_v5 = vpop.eup %9567 }
 0x2e8   : > { %v7632_v3 = vsel %vm4396_vm11, %v4395_v22, 0  ;;  %v8142_v11 = vsel %vm4387_vm13, 1.0, %v8108_v21  ;;  %v8128_v46 = vrot.slane %v11016_v5, %v10450_v23  ;;  %v9570_v16 = vpop.eup %9569 }
 0x2e9   : > { %v7701_v40 = vand.u32 4294901760, %v7632_v3  ;;  %v8145_v15 = vsel %vm4387_vm13, 1.0, %v8120_v35  ;;  %v8251_v62 = vrot.slane %v9570_v16, %v10450_v23 }
 0x2ea   : > { %v8147_v7 = vsel %vm4387_vm13, 1.0, %v8128_v46 }
 0x2eb   : > { %9435 = vmatmul.mubr.f32.vlgmr.msra.gmra.mxu1 %v7701_v40  ;;  %v7702_v52 = vsub.f32 %v7632_v3, %v7701_v40  ;;  %v8288_v10 = vsel %vm4387_vm13, 1.0, %v8251_v62 }
 0x2ec   : > { %9445 = vmatpush3.msra.mxu1 %v11236_v53  ;;  %9448 = vmatprep.mubr.msk.f32.mxu1 %vm9705_vm0, %v11200_v0 }
 0x2ed   : > { %9446 = vmatprep.subr.mxu1 %v11200_v0  ;;  %v7703_v37 = vand.u32 4294901760, %v7702_v52 }
 0x2ee   : > { %9447 = vmatpush3.msra.mxu1 %v11237_v20 }
 0x2ef   : > { %9449 = vmatmul.mubr.f32.vlgmr.msra.gmra.mxu1 %v7703_v37  ;;  %9458 = vmatprep.subr.mxu1 %v11200_v0  ;;  %v7704_v59 = vsub.f32 %v7702_v52, %v7703_v37 }
 0x2f0   : > { %9459 = vmatpush3.msra.mxu1 %v11236_v53  ;;  %9462 = vmatprep.mubr.msk.f32.mxu1 %vm9705_vm0, %v11200_v0 }
 0x2f1   : > { %9460 = vmatprep.subr.mxu1 %v11200_v0  ;;  %v7705_v17 = vand.u32 4294901760, %v7704_v59 }
 0x2f2   : > { %9461 = vmatpush3.msra.mxu1 %v11237_v20 }
 0x2f3   : > { %9428 = vmatmul.mubr.f32.vlgmr.msra.gmra.mxu0 %v7705_v17  ;;  %9463 = vmatmul.mubr.f32.vlgmr.msra.gmra.mxu1 %v7701_v40  ;;  %v4242_v49 = vpop.xlane.xlu0 %4241 }
 0x2f4   : > { %9438 = vmatpush3.msra.mxu0 %v11246_v60  ;;  %v4260_v42 = vadd.f32 %v4242_v49, %v4228_v58  ;;  %9441 = vmatprep.mubr.msk.f32.mxu0 %vm9705_vm0, %v11200_v0 }
 0x2f5   : > { %9439 = vmatprep.subr.mxu0 %v11200_v0 }
 0x2f6   : > { %4269 = vst.msk [vmem:[#allocation3 + $0x2] sm:$0x1] %vm251_vm3, %v4260_v42  ;;  %9440 = vmatpush3.msra.mxu0 %v11247_v36 }
 0x2f7   : > { %9442 = vmatmul.mubr.f32.vlgmr.msra.gmra.mxu0 %v7702_v52  ;;  %9451 = vmatprep.subr.mxu0 %v11200_v0  ;;  %v4230_v52 = vmul.f32 %v9566_v26, %v4222_v34 }
 0x2f8   : > { %9452 = vmatpush3.msra.mxu0 %v11248_v54  ;;  %9455 = vmatprep.mubr.msk.f32.mxu0 %vm9705_vm0, %v11200_v0 }
 0x2f9   : > { %9453 = vmatprep.subr.mxu0 %v11200_v0  ;;  %v4221_v0 = vld [vmem:[#allocation3 + $0x3] sm:$0x1] }
 0x2fa   : > { %9454 = vmatpush3.msra.mxu0 %v11249_v39  ;;  %v4229_v19 = vmul.f32 %v10941_v6, %v4221_v0 }
 0x2fb   : > { %9456 = vmatmul.mubr.f32.vlgmr.msra.gmra.mxu0 %v7701_v40 }
 0x2fc   : > { %8164 = vperm.xlu0 %9535, %v8142_v11  }
 0x2fd   : > { %v8226_v8 = vld [vmem:[#allocation3 + $0x2] sm:$0x1] }
 0x2fe   : > { %9571 = vrcp.f32 %v8226_v8 }
 0x300   : > { %8179 = vperm.xlu0 %9535, %v8145_v15  }
 0x304   : > { %8189 = vperm.xlu0 %9535, %v8147_v7   ;;  %v4223_v7 = vld [vmem:[#allocation3 + $0x5] sm:$0x1] }
 0x305   : > { %v4554_v43 = vpop.f32.mrf.mxu1  ;;  %v4245_v18 = vpop.xlane.xlu0 %4244  ;;  %v4231_v30 = vmul.f32 %v10953_v47, %v4223_v7 }
 0x306   : > { %v4261_v2 = vadd.f32 %v4245_v18, %v4229_v19 }
 0x307   : > { %v9142_v48 = vpop.f32.mrf.mxu1 }
 0x308   : > { %v4239_v53 = vpop.xlane.xlu1 %4238  ;;  %4270 = vst.msk [vmem:[#allocation3 + $0x3] sm:$0x1] %vm251_vm3, %v4261_v2  ;;  %8306 = vperm.xlu0 %9535, %v8288_v10  }
 0x309   : > { %v4259_v27 = vadd.f32 %v4239_v53, %v4227_v44  ;;  %v4705_v38 = vpop.f32.mrf.mxu1 }
 0x30b   : > { %v9572_v20 = vpop.eup %9571  ;;  %4268 = vst.msk [vmem:[#allocation3 + $0x1] sm:$0x1] %vm251_vm3, %v4259_v27  ;;  %v9156_v56 = vpop.f32.mrf.mxu1 }
 0x30c   : > { %v8259_v24 = vrot.slane %v9572_v20, %v10450_v23 }
 0x30d   : > { %v4473_v6 = vpop.f32.mrf.mxu0  ;;  %v4855_v61 = vpop.f32.mrf.mxu1 }
 0x30e   : > { %v8290_v12 = vsel %vm4387_vm13, 1.0, %v8259_v24  ;;  %v4555_v50 = vadd.f32 %v4554_v43, %v4473_v6 }
 0x30f   : > { %v9135_v33 = vpop.f32.mrf.mxu0  ;;  %v9170_v41 = vpop.f32.mrf.mxu1  ;;  %8316 = vperm.xlu0 %9535, %v8290_v12   ;;  %v8227_v1 = vld [vmem:[#allocation3 + $0x3] sm:$0x1] }
 0x310   : > { %9573 = vrcp.f32 %v8227_v1  ;;  %v4224_v41 = vld [vmem:[#allocation3 + $0x6] sm:$0x1] }
 0x311   : > { %v4630_v45 = vpop.f32.mrf.mxu0 }
 0x312   : > { %v4631_v14 = vadd.f32 %v4630_v45, %v4555_v50  ;;  %v8225_v25 = vld [vmem:[#allocation3 + $0x1] sm:$0x1]  ;;  %v4232_v45 = vmul.f32 %v11016_v5, %v4224_v41 }
 0x313   : > { %v9149_v28 = vpop.f32.mrf.mxu0  ;;  %9575 = vrcp.f32 %v8225_v25 }
 0x314   : > { %v5016_v29 = vpop.f32.mrf.mxu1  ;;  %v4706_v63 = vadd.f32 %v4705_v38, %v4631_v14 }
 0x316   : > { %v9184_v32 = vpop.f32.mrf.mxu1 }
 0x317   : > { %v4782_v22 = vpop.f32.mrf.mxu0 }
 0x318   : > { %v4783_v3 = vadd.f32 %v4782_v22, %v4706_v63 }
 0x319   : > { %v9163_v40 = vpop.f32.mrf.mxu0 }
 0x31a   : > { %v11029_v4 = vadd.f32 %v4855_v61, %v4783_v3  ;;  %v5167_v57 = vpop.f32.mrf.mxu1  ;;  %v8149_v3 = vld [vmem:[#allocation4] sm:$0x3] }
 0x31c   : > { %v9198_v13 = vpop.f32.mrf.mxu1 }
 0x31d   : > { %v4248_v37 = vpop.xlane.xlu1 %4247  ;;  %v9574_v55 = vpop.eup %9573 }
 0x31e   : > { %v4262_v59 = vadd.f32 %v4248_v37, %v4230_v52  ;;  %v8263_v21 = vrot.slane %v9574_v55, %v10450_v23  ;;  %v8151_v55 = vld [vmem:[#allocation4 + $0x4] sm:$0x3] }
 0x31f   : > { %v4935_v9 = vpop.f32.mrf.mxu0 }
 0x320   : > { %v9576_v17 = vpop.eup %9575  ;;  %v5017_v58 = vadd.f32 %v5016_v29, %v4935_v9  ;;  %v5317_v49 = vpop.f32.mrf.mxu1  ;;  %4271 = vst.msk [vmem:[#allocation3 + $0x4] sm:$0x1] %vm251_vm3, %v4262_v59  ;;  %v8291_v35 = vsel %vm4387_vm13, 1.0, %v8263_v21 }
 0x321   : > { %v9177_v31 = vpop.f32.mrf.mxu0  ;;  %v8255_v60 = vrot.slane %v9576_v17, %v10450_v23 }
 0x322   : > { %v9212_v42 = vpop.f32.mrf.mxu1 }
 0x323   : > { %v8289_v36 = vsel %vm4387_vm13, 1.0, %v8255_v60 }
 0x324   : > { %v5092_v54 = vpop.f32.mrf.mxu0  ;;  %8311 = vperm.xlu1 %9536, %v8289_v36  }
 0x325   : > { %v5093_v26 = vadd.f32 %v5092_v54, %v5017_v58 }
 0x326   : > { %v9191_v39 = vpop.f32.mrf.mxu0 }
 0x327   : > { %v5168_v11 = vadd.f32 %v5167_v57, %v5093_v26  ;;  %v8228_v8 = vld [vmem:[#allocation3 + $0x4] sm:$0x1] }
 0x328   : > { %v5244_v15 = vpop.f32.mrf.mxu0  ;;  %8321 = vperm.xlu1 %9536, %v8291_v35   ;;  %9577 = vrcp.f32 %v8228_v8  ;;  %v8152_v8 = vld [vmem:[#allocation4 + $0x6] sm:$0x3] }
 0x329   : > { %v5245_v46 = vadd.f32 %v5244_v15, %v5168_v11 }
 0x32a   : > { %v9205_v16 = vpop.f32.mrf.mxu0 }
 0x32b   : > { %v11036_v0 = vadd.f32 %v5317_v49, %v5245_v46 }
 0x333   : > { %v5478_v62 = vpop.f32.mrf.mxu1 }
 0x335   : > { %v9578_v19 = vpop.eup %9577  ;;  %v9226_v43 = vpop.f32.mrf.mxu1 }
 0x336   : > { %v4251_v18 = vpop.xlane.xlu0 %4250  ;;  %v8267_v44 = vrot.slane %v9578_v19, %v10450_v23 }
 0x337   : > { %v4263_v2 = vadd.f32 %v4251_v18, %v4231_v30  ;;  %v5629_v10 = vpop.f32.mrf.mxu1 }
 0x338   : > { %v8292_v48 = vsel %vm4387_vm13, 1.0, %v8267_v44 }
 0x339   : > { %4272 = vst.msk [vmem:[#allocation3 + $0x5] sm:$0x1] %vm251_vm3, %v4263_v2  ;;  %v9240_v53 = vpop.f32.mrf.mxu1  ;;  %8326 = vperm.xlu0 %9535, %v8292_v48  }
 0x33b   : > { %v5397_v27 = vpop.f32.mrf.mxu0  ;;  %v5779_v38 = vpop.f32.mrf.mxu1 }
 0x33c   : > { %v5479_v33 = vadd.f32 %v5478_v62, %v5397_v27 }
 0x33d   : > { %v9219_v20 = vpop.f32.mrf.mxu0  ;;  %v9254_v56 = vpop.f32.mrf.mxu1 }
 0x33e   : > { %v4225_v56 = vld [vmem:[#allocation3 + $0x7] sm:$0x1] }
 0x33f   : > { %v5554_v24 = vpop.f32.mrf.mxu0 }
 0x340   : > { %v8229_v6 = vld [vmem:[#allocation3 + $0x5] sm:$0x1]  ;;  %v5555_v1 = vadd.f32 %v5554_v24, %v5479_v33 }
 0x341   : > { %9579 = vrcp.f32 %v8229_v6  ;;  %v9233_v47 = vpop.f32.mrf.mxu0 }
 0x342   : > { %v5630_v32 = vadd.f32 %v5629_v10, %v5555_v1  ;;  %v4233_v47 = vmul.f32 %v10966_v51, %v4225_v56  ;;  %v8155_v56 = vld [vmem:[#allocation4 + $0xc] sm:$0x3] }
 0x344   : > { %v5706_v61 = vpop.f32.mrf.mxu0 }
 0x345   : > { %v5707_v52 = vadd.f32 %v5706_v61, %v5630_v32 }
 0x346   : > { %v9247_v12 = vpop.f32.mrf.mxu0 }
 0x347   : > { %v5780_v31 = vadd.f32 %v5779_v38, %v5707_v52 }
 0x34b   : > { %v5940_v50 = vpop.f32.mrf.mxu1 }
 0x34d   : > { %v9268_v25 = vpop.f32.mrf.mxu1  ;;  %v4254_v28 = vpop.xlane.xlu1 %4253 }
 0x34e   : > { %v9580_v14 = vpop.eup %9579  ;;  %v4264_v29 = vadd.f32 %v4254_v28, %v4232_v45  ;;  %v8150_v25 = vld [vmem:[#allocation4 + $0x2] sm:$0x3] }
 0x34f   : > { %v8271_v63 = vrot.slane %v9580_v14, %v10450_v23  ;;  %v6091_v22 = vpop.f32.mrf.mxu1 }
 0x350   : > { %4273 = vst.msk [vmem:[#allocation3 + $0x6] sm:$0x1] %vm251_vm3, %v4264_v29 }
 0x351   : > { %v8293_v40 = vsel %vm4387_vm13, 1.0, %v8271_v63  ;;  %v9282_v34 = vpop.f32.mrf.mxu1  ;;  %v8160_v57 = vpop.permute.xlu1 %8159 }
 0x352   : > { %8331 = vperm.xlu1 %9536, %v8293_v40   ;;  %v8197_v13 = vmul.f32 %v8160_v57, %v8149_v3  ;;  %v8153_v40 = vld [vmem:[#allocation4 + $0x8] sm:$0x3] }
 0x353   : > { %v5859_v37 = vpop.f32.mrf.mxu0  ;;  %v6241_v5 = vpop.f32.mrf.mxu1 }
 0x354   : > { %v8205_v59 = vadd.f32 %v8197_v13, %v11029_v4  ;;  %v5941_v58 = vadd.f32 %v5940_v50, %v5859_v37 }
 0x355   : > { %v9261_v9 = vpop.f32.mrf.mxu0  ;;  %v9296_v17 = vpop.f32.mrf.mxu1 }
 0x356   : > { %8213 = vst [vmem:[#allocation4] sm:$0x3] %v8205_v59  ;;  %v8170_v49 = vpop.permute.xlu1 %8169 }
 0x357   : > { %v8199_v60 = vmul.f32 %v8170_v49, %v8151_v55  ;;  %v6016_v42 = vpop.f32.mrf.mxu0  ;;  %v8230_v36 = vld [vmem:[#allocation3 + $0x6] sm:$0x1] }
 0x358   : > { %v6017_v21 = vadd.f32 %v6016_v42, %v5941_v58  ;;  %9581 = vrcp.f32 %v8230_v36 }
 0x359   : > { %v8207_v54 = vadd.f32 %v8199_v60, %v5780_v31  ;;  %v9275_v26 = vpop.f32.mrf.mxu0  ;;  %v8154_v60 = vld [vmem:[#allocation4 + $0xa] sm:$0x3] }
 0x35a   : > { %v6092_v39 = vadd.f32 %v6091_v22, %v6017_v21  ;;  %v8175_v35 = vpop.permute.xlu1 %8174 }
 0x35b   : > { %8215 = vst [vmem:[#allocation4 + $0x4] sm:$0x3] %v8207_v54  ;;  %v6402_v11 = vpop.f32.mrf.mxu1  ;;  %v8200_v7 = vmul.f32 %v8175_v35, %v8152_v8 }
 0x35d   : > { %v6168_v4 = vpop.f32.mrf.mxu0  ;;  %v9310_v15 = vpop.f32.mrf.mxu1  ;;  %v8296_v21 = vld [vmem:[#allocation4] sm:$0x3] }
 0x35e   : > { %v6169_v46 = vadd.f32 %v6168_v4, %v6092_v39  ;;  %v8185_v42 = vpop.permute.xlu1 %8184 }
 0x35f   : > { %v9289_v16 = vpop.f32.mrf.mxu0  ;;  %v8202_v39 = vmul.f32 %v8185_v42, %v8154_v60 }
 0x360   : > { %v6242_v62 = vadd.f32 %v6241_v5, %v6169_v46  ;;  %v6553_v30 = vpop.f32.mrf.mxu1 }
 0x362   : > { %v8208_v19 = vadd.f32 %v8200_v7, %v6242_v62  ;;  %v9324_v43 = vpop.f32.mrf.mxu1  ;;  %v8298_v7 = vld [vmem:[#allocation4 + $0x4] sm:$0x3] }
 0x364   : > { %8216 = vst [vmem:[#allocation4 + $0x6] sm:$0x3] %v8208_v19 }
 0x365   : > { %v9582_v18 = vpop.eup %9581  ;;  %v6321_v2 = vpop.f32.mrf.mxu0 }
 0x366   : > { %v6703_v44 = vpop.f32.mrf.mxu1  ;;  %v8275_v10 = vrot.slane %v9582_v18, %v10450_v23  ;;  %v6403_v6 = vadd.f32 %v6402_v11, %v6321_v2 }
 0x367   : > { %v9303_v48 = vpop.f32.mrf.mxu0 }
 0x368   : > { %v9338_v53 = vpop.f32.mrf.mxu1  ;;  %v8294_v27 = vsel %vm4387_vm13, 1.0, %v8275_v10 }
 0x369   : > { %v6478_v38 = vpop.f32.mrf.mxu0  ;;  %8336 = vperm.xlu0 %9535, %v8294_v27  }
 0x36a   : > { %v6479_v33 = vadd.f32 %v6478_v38, %v6403_v6 }
 0x36b   : > { %v9317_v20 = vpop.f32.mrf.mxu0 }
 0x36c   : > { %v6554_v45 = vadd.f32 %v6553_v30, %v6479_v33 }
 0x36d   : > { %v6630_v24 = vpop.f32.mrf.mxu0 }
 0x36e   : > { %v6631_v63 = vadd.f32 %v6630_v24, %v6554_v45 }
 0x36f   : > { %v9331_v61 = vpop.f32.mrf.mxu0  ;;  %v4257_v12 = vpop.xlane.xlu0 %4256 }
 0x370   : > { %v4265_v41 = vadd.f32 %v4257_v12, %v4233_v47  ;;  %v6704_v52 = vadd.f32 %v6703_v44, %v6631_v63  ;;  %v8195_v47 = vpop.permute.xlu1 %8194 }
 0x371   : > { %v6864_v1 = vpop.f32.mrf.mxu1 }
 0x372   : > { %4274 = vst.msk [vmem:[#allocation3 + $0x7] sm:$0x1] %vm251_vm3, %v4265_v41 }
 0x373   : > { %v9352_v50 = vpop.f32.mrf.mxu1 }
 0x375   : > { %v7015_v14 = vpop.f32.mrf.mxu1 }
 0x377   : > { %v8165_v28 = vpop.permute.xlu0 %8164  ;;  %v9366_v29 = vpop.f32.mrf.mxu1 }
 0x378   : > { %v8198_v32 = vmul.f32 %v8165_v28, %v8150_v25 }
 0x379   : > { %v6783_v22 = vpop.f32.mrf.mxu0  ;;  %v7165_v3 = vpop.f32.mrf.mxu1  ;;  %v8231_v34 = vld [vmem:[#allocation3 + $0x7] sm:$0x1] }
 0x37a   : > { %v8206_v51 = vadd.f32 %v8198_v32, %v11036_v0  ;;  %9583 = vrcp.f32 %v8231_v34  ;;  %v6865_v37 = vadd.f32 %v6864_v1, %v6783_v22 }
 0x37b   : > { %v8180_v57 = vpop.permute.xlu0 %8179  ;;  %v9345_v13 = vpop.f32.mrf.mxu0 }
 0x37c   : > { %8214 = vst [vmem:[#allocation4 + $0x2] sm:$0x3] %v8206_v51  ;;  %v8201_v5 = vmul.f32 %v8180_v57, %v8153_v40  ;;  %v9380_v59 = vpop.f32.mrf.mxu1 }
 0x37d   : > { %v6940_v55 = vpop.f32.mrf.mxu0 }
 0x37e   : > { %v8209_v9 = vadd.f32 %v8201_v5, %v6704_v52  ;;  %v6941_v17 = vadd.f32 %v6940_v55, %v6865_v37 }
 0x37f   : > { %v8190_v58 = vpop.permute.xlu0 %8189  ;;  %v9359_v49 = vpop.f32.mrf.mxu0 }
 0x380   : > { %8217 = vst [vmem:[#allocation4 + $0x8] sm:$0x3] %v8209_v9  ;;  %v7016_v31 = vadd.f32 %v7015_v14, %v6941_v17  ;;  %v8203_v12 = vmul.f32 %v8190_v58, %v8155_v56  ;;  %v8299_v14 = vld [vmem:[#allocation4 + $0x6] sm:$0x3]  ;;  %v8156_v17 = vld [vmem:[#allocation4 + $0xe] sm:$0x3] }
 0x381   : > { %v7092_v0 = vpop.f32.mrf.mxu0  ;;  %v8204_v60 = vmul.f32 %v8195_v47, %v8156_v17 }
 0x382   : > { %v7093_v36 = vadd.f32 %v7092_v0, %v7016_v31 }
 0x383   : > { %v8307_v54 = vpop.permute.xlu0 %8306  ;;  %v9373_v26 = vpop.f32.mrf.mxu0  ;;  %v8297_v1 = vld [vmem:[#allocation4 + $0x2] sm:$0x3] }
 0x384   : > { %v7166_v11 = vadd.f32 %v7165_v3, %v7093_v36  ;;  %v8344_v35 = vmul.f32 %v8307_v54, %v8296_v21 }
 0x386   : > { %v8210_v8 = vadd.f32 %v8202_v39, %v7166_v11  ;;  %8352 = vst [vmem:[%s11053_s18] sm:$0x3] %v8344_v35 }
 0x387   : > { %v9584_v4 = vpop.eup %9583  ;;  %v8300_v34 = vld [vmem:[#allocation4 + $0x8] sm:$0x3] }
 0x388   : > { %8218 = vst [vmem:[#allocation4 + $0xa] sm:$0x3] %v8210_v8  ;;  %v8279_v15 = vrot.slane %v9584_v4, %v10450_v23 }
 0x389   : > { %v7326_v46 = vpop.f32.mrf.mxu1 }
 0x38a   : > { %v8295_v16 = vsel %vm4387_vm13, 1.0, %v8279_v15  ;;  %v8317_v62 = vpop.permute.xlu0 %8316 }
 0x38b   : > { %8341 = vperm.xlu1 %9536, %v8295_v16   ;;  %v8346_v30 = vmul.f32 %v8317_v62, %v8298_v7  ;;  %v9394_v19 = vpop.f32.mrf.mxu1 }
 0x38d   : > { %8354 = vst [vmem:[%s11053_s18 + $0x4] sm:$0x3] %v8346_v30  ;;  %v7477_v43 = vpop.f32.mrf.mxu1 }
 0x38f   : > { %v9408_v18 = vpop.f32.mrf.mxu1  ;;  %v8301_v36 = vld [vmem:[#allocation4 + $0xa] sm:$0x3] }
 0x391   : > { %v7245_v2 = vpop.f32.mrf.mxu0  ;;  %v7627_v44 = vpop.f32.mrf.mxu1 }
 0x392   : > { %v7327_v53 = vadd.f32 %v7326_v46, %v7245_v2 }
 0x393   : > { %v9387_v10 = vpop.f32.mrf.mxu0  ;;  %v9422_v48 = vpop.f32.mrf.mxu1 }
 0x395   : > { %v7402_v27 = vpop.f32.mrf.mxu0 }
 0x396   : > { %v7403_v38 = vadd.f32 %v7402_v27, %v7327_v53 }
 0x397   : > { %v9401_v23 = vpop.f32.mrf.mxu0 }
 0x398   : > { %v7478_v20 = vadd.f32 %v7477_v43, %v7403_v38 }
 0x399   : > { %v7554_v24 = vpop.f32.mrf.mxu0 }
 0x39a   : > { %v7555_v6 = vadd.f32 %v7554_v24, %v7478_v20 }
 0x39b   : > { %v9415_v61 = vpop.f32.mrf.mxu0 }
 0x39c   : > { %v7628_v33 = vadd.f32 %v7627_v44, %v7555_v6 }
 0x39e   : > { %v8211_v41 = vadd.f32 %v8203_v12, %v7628_v33 }
 0x39f   : > { %v8312_v50 = vpop.permute.xlu1 %8311 }
 0x3a0   : > { %8219 = vst [vmem:[#allocation4 + $0xc] sm:$0x3] %v8211_v41  ;;  %v8345_v45 = vmul.f32 %v8312_v50, %v8297_v1 }
 0x3a2   : > { %8353 = vst [vmem:[%s11053_s18 + $0x2] sm:$0x3] %v8345_v45 }
 0x3a3   : > { %v8322_v25 = vpop.permute.xlu1 %8321 }
 0x3a4   : > { %v8347_v28 = vmul.f32 %v8322_v25, %v8299_v14 }
 0x3a6   : > { %8355 = vst [vmem:[%s11053_s18 + $0x6] sm:$0x3] %v8347_v28 }
 0x3a7   : > { %v8302_v26 = vld [vmem:[#allocation4 + $0xc] sm:$0x3] }
 0x3ab   : > { %v7788_v29 = vpop.f32.mrf.mxu1 }
 0x3ad   : > { %v9436_v63 = vpop.f32.mrf.mxu1 }
 0x3af   : > { %v7939_v32 = vpop.f32.mrf.mxu1 }
 0x3b1   : > { %v9450_v22 = vpop.f32.mrf.mxu1 }
 0x3b3   : > { %v7707_v3 = vpop.f32.mrf.mxu0  ;;  %v8089_v40 = vpop.f32.mrf.mxu1 }
 0x3b4   : > { %v8327_v51 = vpop.permute.xlu0 %8326  ;;  %v7789_v37 = vadd.f32 %v7788_v29, %v7707_v3 }
 0x3b5   : > { %v9429_v57 = vpop.f32.mrf.mxu0  ;;  %v9464_v13 = vpop.f32.mrf.mxu1  ;;  %v8348_v52 = vmul.f32 %v8327_v51, %v8300_v34 }
 0x3b7   : > { %8356 = vst [vmem:[%s11053_s18 + $0x8] sm:$0x3] %v8348_v52  ;;  %v7864_v5 = vpop.f32.mrf.mxu0 }
 0x3b8   : > { %v7865_v59 = vadd.f32 %v7864_v5, %v7789_v37 }
 0x3b9   : > { %v9443_v55 = vpop.f32.mrf.mxu0 }
 0x3ba   : > { %v7940_v9 = vadd.f32 %v7939_v32, %v7865_v59 }
 0x3bb   : > { %v8016_v58 = vpop.f32.mrf.mxu0 }
 0x3bc   : > { %v8017_v49 = vadd.f32 %v8016_v58, %v7940_v9 }
 0x3bd   : > { %v9457_v31 = vpop.f32.mrf.mxu0 }
 0x3be   : > { %v8090_v42 = vadd.f32 %v8089_v40, %v8017_v49 }
 0x3c0   : > { %v8212_v0 = vadd.f32 %v8204_v60, %v8090_v42 }
 0x3c2   : > { %8220 = vst [vmem:[#allocation4 + $0xe] sm:$0x3] %v8212_v0 }
 0x3c9   : > { %v8303_v35 = vld [vmem:[#allocation4 + $0xe] sm:$0x3] }
 0x3cd   : > { %v8332_v21 = vpop.permute.xlu1 %8331 }
 0x3ce   : > { %v8349_v54 = vmul.f32 %v8332_v21, %v8301_v36 }
 0x3d0   : > { %8357 = vst [vmem:[%s11053_s18 + $0xa] sm:$0x3] %v8349_v54 }
 0x3e4   : > { %v8337_v39 = vpop.permute.xlu0 %8336 }
 0x3e5   : > { %v8350_v11 = vmul.f32 %v8337_v39, %v8302_v26 }
 0x3e7   : > { %8358 = vst [vmem:[%s11053_s18 + $0xc] sm:$0x3] %v8350_v11 }
 0x406   : > { %v8342_v8 = vpop.permute.xlu1 %8341 }
 0x407   : > { %v8351_v4 = vmul.f32 %v8342_v8, %v8303_v35 }
 0x409   : > { %8359 = vst [vmem:[%s11053_s18 + $0xe] sm:$0x3] %v8351_v4 }
 0x40a   : > { %9632 = shalt.err (!%p9629_p7)
}
 0x40b   : > { %s9633_s6 = scalar_lea.hbm %s11071_s29, 256  ;;  %s9637_s9 = scalar_lea.hbm %s11123_s3, 512 }
 0x40c   : > { %p9634_p10 = scmp.ne.s32.totalorder %s11071_s29, %s9633_s6  ;;  %p9638_p2 = scmp.lt.s32.totalorder %s11071_s29, %s11123_s3 }
 0x40d   : > { %p9639_p8 = scmp.lt.s32.totalorder %s9637_s9, %s9633_s6 }
 0x40e   : > { %p9635_p4 = pnand %p9634_p10, %p9782_p9 }
 0x40f   : > { %p9640_p12 = por %p9639_p8, %p9638_p2 }
 0x410   : > { %p9636_p13 = pneg %p9635_p4 }
 0x412   : > { %p9641_p0 = pnand %p9640_p12, %p9636_p13 }
 0x414   : > { %9644 = shalt.err (!%p9641_p0)
}
 0x415   : > { %s9709_s18 = smov 32   ;;  %s9710_s21 = smov 2  }
 0x416   : > { %9467 = dma.vmem_to_hbm [thread:$0]  (%p9782_p9), %s11066_s19, 256, %s11071_s29, %s8361_s30, %s9709_s18, %s9709_s18, %s9710_s21  }
 0x417 PF: > { %s8389_s22 = sand.u32 1, %s9679_s12   ;;  %p11250_p1 = scmp.ge.s32.totalorder %s9699_s17, 2 }
 0x418   : > { %s8390_s23 = scalar_lea.sflag [#allocation7], %s8389_s22 }
 0x419   : > { %p9474_p3 = pnand %p11250_p1, %p9789_p11 }
 0x41b   : > { %p9475_p5 = pneg %p9474_p3 }
 0x41d   : > { %9674 = dma.done.wait (%p9475_p5), %s8390_s23, 256  }
 0x41e   : > { %9676 = vsyncadd (%p9475_p5), %s8390_s23, 4294967040  ;;  %s19_s17 = sadd.s32 1, %s9699_s17   ;;  %s11251_s12 = smov %s9683_s13 }
 0x41f   : > { %p16_p6 = scmp.ge.s32.totalorder %s19_s17, 4   ;;  %s11252_s13 = smov %s9687_s14 }
 0x420   : > { %s11253_s14 = smov %s9787_s26  ;;  %s11254_s15 = smov %s9695_s16 }
 0x421   : > { %s11255_s16 = smov %s11257_s20  ;;  %18 = sbr.rel (!%p16_p6) target bundleno = 6 (0x6), region = 91 }
 0x426   :  { %8395 = vsyncpa [#allocation6], 1 }
 0x427   :  { %8397 = vsyncpa [#allocation6 + $0x1], 1 }
 0x428   :  { %8398 = vsyncpa [#allocation7], 1 }
 0x429   :  { %8400 = vsyncpa [#allocation7 + $0x1], 1 }

</bundles_post_ra>
